<compile_context>
chip_gen: v5e
topology: v5e:2x2
jax: 0.10.0
libtpu: 0.0.40
codegen_flags: <defaults>
</compile_context>

<pallas_src>
import jax
import jax.numpy as jnp
from jax.experimental import pallas as pl
from jax.experimental.pallas import tpu as pltpu


def _round_up(n, m):
    return ((n + m - 1) // m) * m


def _pick_t_tile(T, target):
    """Largest T tile that divides T exactly: full T if small or ragged,
    otherwise a multiple of 128 <= target (avoids any jnp.pad copy of x)."""
    if T <= target or T % 128 != 0:
        return T
    t = (min(target, T) // 128) * 128
    while t >= 128:
        if T % t == 0:
            return t
        t -= 128
    return T


# ----------------------------------------------------------------------------
# Fused NormalHead kernel (one (batch, T-tile) block per grid step)
# ----------------------------------------------------------------------------

def _normal_head_kernel(x_ref, w1_ref, w2_ref, p_ref, o_ref):
    """x_ref : (1, C, TT)  f32   input tile, native channels-first layout
       w1_ref: (CP, C)     bf16  conv1 weight^T, rows [0,C1) live, rest zero
       w2_ref: (CP, CP)    bf16  conv2 weight^T, block [C1,C1+C2)x[0,C1) live
       p_ref : (CP, 16)    f32   packed per-channel columns:
                 0: conv1 bias   1: bn1 scale   2: bn1 shift   (rows [0,C1))
                 3: conv2 bias   4: bn2 scale   5: bn2 shift   (rows [C1,C1+C2))
                 6: conv3 weight (rows [C1,C1+C2))
                 7: score one-hot (row C1+C2)    8: conv3 bias (row 0)
       o_ref : (1, CP, TT) f32   dense output slab:
                 rows [0,C1)      conv1 output (pre-BN)      == outputs[0]
                 rows [C1,C1+C2)  conv2 output (pre-BN)      == outputs[1]
                 row  C1+C2       sigmoid(conv3(...)) score  == outputs[2]
    """
    x = x_ref[0].astype(jnp.bfloat16)                 # (C, TT); cast in-kernel
    p = p_ref[...]
    b1, s1, t1 = p[:, 0:1], p[:, 1:2], p[:, 2:3]
    b2, s2, t2 = p[:, 3:4], p[:, 4:5], p[:, 5:6]
    w3_col = p[:, 6:7]
    score_hot = p[:, 7:8]
    b3 = p[0:1, 8:9]

    # conv1 (1x1): bf16 MXU matmul, f32 accumulation; padded rows stay exact 0.
    f1 = jnp.dot(w1_ref[...], x, preferred_element_type=jnp.float32) + b1
    # bn1 (eval, folded) + ReLU in f32 on the VPU.
    h1 = jnp.maximum(f1 * s1 + t1, 0.0)
    # conv2 (1x1): padded weight drops its output directly into rows [C1,C1+C2).
    f2 = jnp.dot(w2_ref[...], h1.astype(jnp.bfloat16),
                 preferred_element_type=jnp.float32) + b2
    h2 = jnp.maximum(f2 * s2 + t2, 0.0)
    # conv3 (C_out=1): VPU multiply + cross-sublane (XLU) reduce, not MXU.
    score = jax.nn.sigmoid(jnp.sum(h2 * w3_col, axis=0, keepdims=True) + b3)

    # f1 / f2 / score occupy disjoint rows by construction -> one dense store.
    o_ref[0] = f1 + f2 + score * score_hot


# ----------------------------------------------------------------------------
# Wrapper
# ----------------------------------------------------------------------------

def normal_head_forward(x, params, eps=1e-5, block_t=1024):
    """NormalHead forward. x: (B, C, T) float32 (native PyTorch NCT layout).

    Returns [conv1_out (B,C1,T), conv2_out (B,C2,T), scores (B,T)].
    """
    B, C, T = x.shape
    c1 = params["w1"].shape[1]
    c2 = params["w2"].shape[1]
    cp = _round_up(c1 + c2 + 1, 8)        # sublane-padded output rows

    x = x.astype(jnp.float32)

    # Transposed, row-padded conv weights (bf16 operands for the MXU).
    w1p = jnp.zeros((cp, C), jnp.float32).at[:c1, :].set(params["w1"].T)
    w2p = jnp.zeros((cp, cp), jnp.float32).at[c1:c1 + c2, :c1].set(params["w2"].T)
    w1p = w1p.astype(jnp.bfloat16)
    w2p = w2p.astype(jnp.bfloat16)

    # Fold eval-mode BatchNorm into per-channel scale/shift.
    s1 = params["bn1_g"] * jax.lax.rsqrt(params["bn1_v"] + eps)
    t1 = params["bn1_b"] - params["bn1_m"] * s1
    s2 = params["bn2_g"] * jax.lax.rsqrt(params["bn2_v"] + eps)
    t2 = params["bn2_b"] - params["bn2_m"] * s2

    def _col(v, start):
        v = jnp.asarray(v, jnp.float32)
        return jnp.zeros((cp,), jnp.float32).at[start:start + v.shape[0]].set(v)

    cols = [
        _col(params["b1"], 0), _col(s1, 0), _col(t1, 0),
        _col(params["b2"], c1), _col(s2, c1), _col(t2, c1),
        _col(params["w3"][:, 0], c1),
        _col(jnp.ones((1,), jnp.float32), c1 + c2),   # score one-hot row
        _col(params["b3"], 0),                        # conv3 bias at row 0
    ]
    cols += [jnp.zeros((cp,), jnp.float32)] * (16 - len(cols))
    pslab = jnp.stack(cols, axis=1)                   # (CP, 16) f32

    tt = _pick_t_tile(T, block_t)                     # divides T: no pad copy
    grid = (B, T // tt)

    cost = pl.CostEstimate(
        flops=2 * B * T * (C * c1 + c1 * c2 + c2),
        transcendentals=B * T,
        bytes_accessed=(x.size * 4 + B * cp * T * 4
                        + w1p.size * 2 + w2p.size * 2 + pslab.size * 4))

    slab = pl.pallas_call(
        _normal_head_kernel,
        out_shape=jax.ShapeDtypeStruct((B, cp, T), jnp.float32),
        grid=grid,
        in_specs=[
            pl.BlockSpec((1, C, tt), lambda b, t: (b, 0, t)),   # x tile
            pl.BlockSpec((cp, C), lambda b, t: (0, 0)),         # w1^T (resident)
            pl.BlockSpec((cp, cp), lambda b, t: (0, 0)),        # w2^T (resident)
            pl.BlockSpec((cp, 16), lambda b, t: (0, 0)),        # packed vectors
        ],
        out_specs=pl.BlockSpec((1, cp, tt), lambda b, t: (b, 0, t)),
        compiler_params=pltpu.CompilerParams(
            dimension_semantics=("parallel", "parallel")),      # v7x: 2 TCs
        cost_estimate=cost,
    )(x, w1p, w2p, pslab)

    # Contiguous channel-row slices; no transposes needed anywhere.
    f1 = slab[:, :c1, :]                  # (B, C1, T)
    f2 = slab[:, c1:c1 + c2, :]           # (B, C2, T)
    scores = slab[:, c1 + c2, :]          # (B, T)
    return [f1, f2, scores]


# ----------------------------------------------------------------------------
# Pure-JAX f32 reference + deterministic init
# ----------------------------------------------------------------------------

def normal_head_ref(x, params, eps=1e-5):
    B, C, T = x.shape
    x2 = jnp.transpose(x, (0, 2, 1)).reshape(B * T, C)
    f1 = x2 @ params["w1"] + params["b1"]
    h1 = jnp.maximum((f1 - params["bn1_m"]) * jax.lax.rsqrt(params["bn1_v"] + eps)
                     * params["bn1_g"] + params["bn1_b"], 0.0)
    f2 = h1 @ params["w2"] + params["b2"]
    h2 = jnp.maximum((f2 - params["bn2_m"]) * jax.lax.rsqrt(params["bn2_v"] + eps)
                     * params["bn2_g"] + params["bn2_b"], 0.0)
    s = jax.nn.sigmoid(h2 @ params["w3"] + params["b3"])
    c1, c2 = f1.shape[-1], f2.shape[-1]
    return [f1.reshape(B, T, c1).transpose(0, 2, 1),
            f2.reshape(B, T, c2).transpose(0, 2, 1),
            s.reshape(B, T)]


def init_params(key, in_dim=512, ratios=(16, 32)):
    c1 = in_dim // ratios[0]
    c2 = in_dim // ratios[1]
    k = iter(jax.random.split(key, 16))

    def w(shape, scale=0.05):
        return scale * jax.random.normal(next(k), shape, jnp.float32)

    return {
        # conv weights stored as (C_in, C_out) == torch conv.weight[o, i, 0].T
        "w1": w((in_dim, c1)), "b1": w((c1,)),
        "bn1_g": 1.0 + w((c1,), 0.1), "bn1_b": w((c1,), 0.1),
        "bn1_m": w((c1,), 0.1),
        "bn1_v": 1.0 + 0.1 * jax.random.uniform(next(k), (c1,), jnp.float32),
        "w2": w((c1, c2)), "b2": w((c2,)),
        "bn2_g": 1.0 + w((c2,), 0.1), "bn2_b": w((c2,), 0.1),
        "bn2_m": w((c2,), 0.1),
        "bn2_v": 1.0 + 0.1 * jax.random.uniform(next(k), (c2,), jnp.float32),
        "w3": w((c2, 1)), "b3": w((1,)),
    }


# ----------------------------------------------------------------------------

if __name__ == "__main__":
    B, T, IN_DIM = 2, 256, 512           # module defaults: in_dim=512, ratios=[16,32]
    RATIOS = (16, 32)
    C1, C2 = IN_DIM // RATIOS[0], IN_DIM // RATIOS[1]

    kp, kx = jax.random.split(jax.random.PRNGKey(0))
    params = init_params(kp, IN_DIM, RATIOS)
    x = jax.random.normal(kx, (B, IN_DIM, T), jnp.float32)   # (B, C, T) NCT layout

    fwd = jax.jit(normal_head_forward)
    out = jax.block_until_ready(fwd(x, params))
    ref = normal_head_ref(x, params)

    assert out[0].shape == (B, C1, T)
    assert out[1].shape == (B, C2, T)
    assert out[2].shape == (B, T)
    for o, r in zip(out, ref):
        assert bool(jnp.all(jnp.isfinite(o)))
        # bf16 matmul operands (f32 accumulation) -> loose tolerance vs f32 ref
        assert bool(jnp.allclose(o, r, atol=5e-2, rtol=5e-2)), "mismatch vs f32 reference"
    assert bool(jnp.all((out[2] >= 0.0) & (out[2] <= 1.0)))
    print("KERNEL_OK")
</pallas_src>

<mosaic_0001>
module attributes {stable_mosaic.version = 11 : i64} {
  func.func @_normal_head_kernel(%arg0: i32, %arg1: i32, %arg2: memref<1x512x256xf32, #tpu.memory_space<vmem>>, %arg3: memref<56x512xbf16, #tpu.memory_space<vmem>>, %arg4: memref<56x56xbf16, #tpu.memory_space<vmem>>, %arg5: memref<56x16xf32, #tpu.memory_space<vmem>>, %arg6: memref<1x56x256xf32, #tpu.memory_space<vmem>>) attributes {dimension_semantics = [#tpu.dimension_semantics<parallel>, #tpu.dimension_semantics<parallel>], iteration_bounds = array<i64: 2, 1>, scalar_prefetch = 0 : i64, scratch_operands = 0 : i64, tpu.core_type = #tpu.core_type<tc>, window_params = [{transform_indices = @transform_0, window_bounds = array<i64: 1, 512, 256>}, {pipeline_mode = #tpu.pipeline_mode<synchronous>, transform_indices = @transform_1, window_bounds = array<i64: 56, 512>}, {pipeline_mode = #tpu.pipeline_mode<synchronous>, transform_indices = @transform_2, window_bounds = array<i64: 56, 56>}, {pipeline_mode = #tpu.pipeline_mode<synchronous>, transform_indices = @transform_3, window_bounds = array<i64: 56, 16>}, {transform_indices = @transform_4, window_bounds = array<i64: 1, 56, 256>}]} {
    %c0 = arith.constant 0 : index
    %c0_0 = arith.constant 0 : index
    %c0_1 = arith.constant 0 : index
    %0 = vector.load %arg2[%c0, %c0_0, %c0_1] : memref<1x512x256xf32, #tpu.memory_space<vmem>>, vector<1x512x256xf32>
    %1 = vector.shape_cast %0 : vector<1x512x256xf32> to vector<512x256xf32>
    %2 = arith.truncf %1 : vector<512x256xf32> to vector<512x256xbf16>
    %c0_2 = arith.constant 0 : index
    %c0_3 = arith.constant 0 : index
    %3 = vector.load %arg5[%c0_2, %c0_3] : memref<56x16xf32, #tpu.memory_space<vmem>>, vector<56x16xf32>
    %4 = vector.extract_strided_slice %3 {offsets = [0, 0], sizes = [56, 1], strides = [1, 1]} : vector<56x16xf32> to vector<56x1xf32>
    %5 = vector.extract_strided_slice %3 {offsets = [0, 1], sizes = [56, 1], strides = [1, 1]} : vector<56x16xf32> to vector<56x1xf32>
    %6 = vector.extract_strided_slice %3 {offsets = [0, 2], sizes = [56, 1], strides = [1, 1]} : vector<56x16xf32> to vector<56x1xf32>
    %7 = vector.extract_strided_slice %3 {offsets = [0, 3], sizes = [56, 1], strides = [1, 1]} : vector<56x16xf32> to vector<56x1xf32>
    %8 = vector.extract_strided_slice %3 {offsets = [0, 4], sizes = [56, 1], strides = [1, 1]} : vector<56x16xf32> to vector<56x1xf32>
    %9 = vector.extract_strided_slice %3 {offsets = [0, 5], sizes = [56, 1], strides = [1, 1]} : vector<56x16xf32> to vector<56x1xf32>
    %10 = vector.extract_strided_slice %3 {offsets = [0, 6], sizes = [56, 1], strides = [1, 1]} : vector<56x16xf32> to vector<56x1xf32>
    %11 = vector.extract_strided_slice %3 {offsets = [0, 7], sizes = [56, 1], strides = [1, 1]} : vector<56x16xf32> to vector<56x1xf32>
    %12 = vector.extract_strided_slice %3 {offsets = [0, 8], sizes = [1, 1], strides = [1, 1]} : vector<56x16xf32> to vector<1x1xf32>
    %c0_4 = arith.constant 0 : index
    %c0_5 = arith.constant 0 : index
    %13 = vector.load %arg3[%c0_4, %c0_5] : memref<56x512xbf16, #tpu.memory_space<vmem>>, vector<56x512xbf16>
    %cst = arith.constant dense<0.000000e+00> : vector<56x256xf32>
    %14 = tpu.matmul %13, %2, %cst {dimension_numbers = #tpu.dot_dimension_numbers<[1], [0], [0], [1], [0, 0, 1, 1], [], []>} : vector<56x512xbf16>, vector<512x256xbf16>, vector<56x256xf32> -> vector<56x256xf32>
    %15 = vector.broadcast %4 : vector<56x1xf32> to vector<56x256xf32>
    %16 = arith.addf %14, %15 : vector<56x256xf32>
    %17 = vector.broadcast %5 : vector<56x1xf32> to vector<56x256xf32>
    %18 = arith.mulf %16, %17 : vector<56x256xf32>
    %19 = vector.broadcast %6 : vector<56x1xf32> to vector<56x256xf32>
    %20 = arith.addf %18, %19 : vector<56x256xf32>
    %cst_6 = arith.constant 0.000000e+00 : f32
    %21 = vector.broadcast %cst_6 : f32 to vector<56x256xf32>
    %22 = arith.maximumf %20, %21 : vector<56x256xf32>
    %c0_7 = arith.constant 0 : index
    %c0_8 = arith.constant 0 : index
    %23 = vector.load %arg4[%c0_7, %c0_8] : memref<56x56xbf16, #tpu.memory_space<vmem>>, vector<56x56xbf16>
    %24 = arith.truncf %22 : vector<56x256xf32> to vector<56x256xbf16>
    %cst_9 = arith.constant dense<0.000000e+00> : vector<56x256xf32>
    %25 = tpu.matmul %23, %24, %cst_9 {dimension_numbers = #tpu.dot_dimension_numbers<[1], [0], [0], [1], [0, 0, 1, 1], [], []>} : vector<56x56xbf16>, vector<56x256xbf16>, vector<56x256xf32> -> vector<56x256xf32>
    %26 = vector.broadcast %7 : vector<56x1xf32> to vector<56x256xf32>
    %27 = arith.addf %25, %26 : vector<56x256xf32>
    %28 = vector.broadcast %8 : vector<56x1xf32> to vector<56x256xf32>
    %29 = arith.mulf %27, %28 : vector<56x256xf32>
    %30 = vector.broadcast %9 : vector<56x1xf32> to vector<56x256xf32>
    %31 = arith.addf %29, %30 : vector<56x256xf32>
    %cst_10 = arith.constant 0.000000e+00 : f32
    %32 = vector.broadcast %cst_10 : f32 to vector<56x256xf32>
    %33 = arith.maximumf %31, %32 : vector<56x256xf32>
    %34 = vector.broadcast %10 : vector<56x1xf32> to vector<56x256xf32>
    %35 = arith.mulf %33, %34 : vector<56x256xf32>
    %cst_11 = arith.constant dense<0.000000e+00> : vector<256xf32>
    %36 = vector.multi_reduction <add>, %35, %cst_11 [0] : vector<56x256xf32> to vector<256xf32>
    %37 = vector.shape_cast %36 : vector<256xf32> to vector<1x256xf32>
    %38 = vector.broadcast %12 : vector<1x1xf32> to vector<1x256xf32>
    %39 = arith.addf %37, %38 : vector<1x256xf32>
    %40 = arith.negf %39 : vector<1x256xf32>
    %41 = math.exp %40 : vector<1x256xf32>
    %cst_12 = arith.constant 1.000000e+00 : f32
    %42 = vector.broadcast %cst_12 : f32 to vector<1x256xf32>
    %43 = arith.addf %42, %41 : vector<1x256xf32>
    %44 = arith.divf %42, %43 : vector<1x256xf32>
    %45 = arith.addf %16, %27 : vector<56x256xf32>
    %46 = vector.broadcast %44 : vector<1x256xf32> to vector<56x256xf32>
    %47 = vector.broadcast %11 : vector<56x1xf32> to vector<56x256xf32>
    %48 = arith.mulf %46, %47 : vector<56x256xf32>
    %49 = arith.addf %45, %48 : vector<56x256xf32>
    %c0_13 = arith.constant 0 : index
    %c0_14 = arith.constant 0 : index
    %c0_15 = arith.constant 0 : index
    %50 = vector.load %arg6[%c0_13, %c0_14, %c0_15] : memref<1x56x256xf32, #tpu.memory_space<vmem>>, vector<1x56x256xf32>
    %51 = vector.shape_cast %50 : vector<1x56x256xf32> to vector<56x256xf32>
    %52 = vector.shape_cast %49 : vector<56x256xf32> to vector<1x56x256xf32>
    tpu.vector_store %arg6[%c0_13, %c0_14, %c0_15], %52 {strides = array<i32>} : memref<1x56x256xf32, #tpu.memory_space<vmem>>, vector<1x56x256xf32>,
    return
  }
  func.func @transform_0(%arg0: i32, %arg1: i32) -> (i32, i32, i32) {
    %c0_i32 = arith.constant 0 : i32
    %c0_i32_0 = arith.constant 0 : i32
    return %arg0, %c0_i32, %arg1 : i32, i32, i32
  }
  func.func @transform_1(%arg0: i32, %arg1: i32) -> (i32, i32) {
    %c0_i32 = arith.constant 0 : i32
    %c0_i32_0 = arith.constant 0 : i32
    %c0_i32_1 = arith.constant 0 : i32
    return %c0_i32, %c0_i32_0 : i32, i32
  }
  func.func @transform_2(%arg0: i32, %arg1: i32) -> (i32, i32) {
    %c0_i32 = arith.constant 0 : i32
    %c0_i32_0 = arith.constant 0 : i32
    %c0_i32_1 = arith.constant 0 : i32
    return %c0_i32, %c0_i32_0 : i32, i32
  }
  func.func @transform_3(%arg0: i32, %arg1: i32) -> (i32, i32) {
    %c0_i32 = arith.constant 0 : i32
    %c0_i32_0 = arith.constant 0 : i32
    %c0_i32_1 = arith.constant 0 : i32
    return %c0_i32, %c0_i32_0 : i32, i32
  }
  func.func @transform_4(%arg0: i32, %arg1: i32) -> (i32, i32, i32) {
    %c0_i32 = arith.constant 0 : i32
    %c0_i32_0 = arith.constant 0 : i32
    return %arg0, %c0_i32, %arg1 : i32, i32, i32
  }
}

</mosaic_0001>

<bundles_post_ra>
// kernel: normal_head_forward.1
= control target key start
LH: loop header
LB: loop body
LE: loop exit
PB: predicated region body
PF: predicated region fallthrough
CT: control target
= control target key end

     0   :  { %9 = vsyncpa [#allocation3], 0  ;;  %s2674_s0 = inlined_call_operand.hbm [shape: f32[2,512,256], index: 0, kind: input, shape index: {}]   ;;  %s2675_s1 = inlined_call_operand.vmem [shape: bf16[56,512], index: 1, kind: input, shape index: {}]   ;;  %s2676_s2 = inlined_call_operand.vmem [shape: bf16[56,56], index: 2, kind: input, shape index: {}]   ;;  %s2677_s3 = inlined_call_operand.vmem [shape: f32[56,16], index: 3, kind: input, shape index: {}]   ;;  %s2678_s4 = inlined_call_operand.vmem [shape: f32[2,56,256], index: 4, kind: output, shape index: {}]  }
   0x1   :  { %11 = vsyncpa [#allocation3 + $0x1], 0  ;;  %s1764_s15 = smov 0   ;;  %s1766_s16 = smov 0  }
   0x2   :  { %s1768_s17 = smov 0   ;;  %s1770_s18 = smov 0  }
   0x3   :  { %s1772_s19 = smov 0   ;;  %s1774_s20 = smov 0  }
   0x4 LB: > { %s1419_s21 = sadd.s32 4294967295, %s1726_s20   ;;  %s29_s22 = sadd.s32 1, %s1722_s19  ;;  %s1726_s20 = sphi %s1774_s20, %s17_s20   ;;  %s1722_s19 = sphi %s1772_s19, %s2700_s19   ;;  %s1718_s18 = sphi %s1770_s18, %s2699_s18   ;;  %s1714_s17 = sphi %s1768_s17, %s2698_s17   ;;  %s1710_s16 = sphi %s1766_s16, %s2697_s16   ;;  %s1706_s15 = sphi %s1764_s15, %s2696_s15  }
   0x5   : > { %p31_p0 = scmp.ge.s32.totalorder %s29_s22, 2  ;;  %s38_s23 = sadd.s32 1, %s1714_s17 }
   0x6   : > { %p45_p1 = scmp.ne.s32.totalorder %s1714_s17, %s1710_s16  ;;  %p46_p2 = scmp.eq.s32.totalorder %s1726_s20, 0 }
   0x7   : > { %s2702_s22 = smov (%p31_p0, %s29_s22), 0  ;;  %p51_p4 = scmp.ne.s32.totalorder %s1710_s16, %s1706_s15 }
   0x8   : > { %p1800_p3 = por %p46_p2, %p45_p1  ;;  %s33_s25 = ssub.s32 %s1722_s19, %s2702_s22 }
   0x9   : > { %p52_p5 = scmp.eq.s32.totalorder %s1419_s21, 0  ;;  %p36_p6 = scmp.eq.s32.totalorder %s33_s25, 0 }
   0xa   : > { %p1540_p8 = scmp.lt.s32.totalorder %s1726_s20, 2  ;;  %s175_s28 = sand.u32 1, %s1714_s17  }
   0xb   : > { %p1807_p7 = por %p52_p5, %p51_p4  ;;  %s1501_s29 = sshll.u32 %s1722_s19, 10 }
   0xc   : > { %s1813_s27 = scalar_select %p36_p6, %s1714_s17, %s38_s23  }
   0xd   : > { %s1423_s30 = sshll.u32 %s175_s28, 10  ;;  %s186_s7 = scalar_lea.hbm %s2674_s0, %s1501_s29 }
   0xe   : > { %s187_s8 = sshll.u32 %s186_s7, 4  ;;  %s179_s9 = scalar_lea.vmem [#allocation2], %s1423_s30  ;;  %s188_s8 = int_to_ptr.hbm [resolvable:$true] %s187_s8 }
   0xf   : > { %s189_s10 = sshll.u32 %s179_s9, 4  ;;  %p1537_p9 = pnand %p1540_p8, %p1800_p3  ;;  %s190_s10 = int_to_ptr.vmem [resolvable:$true] %s189_s10 }
  0x10   : > { %p1426_p10 = scmp.ge.s32.totalorder %s1726_s20, 1  ;;  %p197_p11 = scmp.lt.s32.totalorder %s1726_s20, 3 }
  0x11   : > { %s176_s11 = scalar_lea.sflag [#allocation3], %s175_s28  ;;  %s1728_s12 = smov 256  }
  0x12   : > { %s1729_s13 = smov 16   ;;  %p198_p12 = pnand %p1426_p10, %p197_p11 }
  0x13   : > { %1539 = dma.hbm_to_vmem [thread:$0]  (!%p1537_p9), %s188_s8, 16384, %s190_s10, %s176_s11, %s1728_s12, %s1728_s12, %s1729_s13  }
  0x14   : > { %201 = sbr.rel (%p198_p12) target bundleno = 608 (0x260), region = 36 }
  0x19   : > { %s203_s14 = sand.u32 1, %s1710_s16  }
  0x1a   : > { %s1427_s15 = sshll.u32 %s203_s14, 10  ;;  %s204_s21 = scalar_lea.sflag [#allocation3], %s203_s14 }
  0x1b   : > { %s1825_s23 = scalar_lea.vmem [#allocation2], %s1427_s15 }
  0x1c   : > { %1701 = dma.done.wait (%p1807_p7), %s204_s21, 16384  }
  0x1d   : > { %1703 = vsyncadd (%p1807_p7), %s204_s21, 4294950912  ;;  %v277_v0 = vld [vmem:[%s1825_s23 + $0xe0] sm:$0xff]  ;;  %v279_v1 = vld [vmem:[%s1825_s23 + $0xf0] sm:$0xff]  ;;  %v1730_v14 = vmov 0   ;;  %vm967_vm0 = vcmask 1043456   ;;  %vm954_vm1 = vcmask 457728  }
  0x1e   : > { %v309_v2 = vld [vmem:[%s1825_s23 + $0x1e0] sm:$0xff]  ;;  %v391_v3 = vpack.c.bf16 %v279_v1, %v277_v0  ;;  %v311_v4 = vld [vmem:[%s1825_s23 + $0x1f0] sm:$0xff]  ;;  %1601 = vset.pattern.permute.xlu1 %v1730_v14  ;;  %1600 = vset.pattern.permute.xlu0 %v1730_v14  ;;  %v1870_v38 = vld [vmem:[%s2677_s3 + $0x18] sm:$0xff]  ;;  %p239_p13 = scmp.lt.s32.totalorder %s1718_s18, 1 }
  0x1f   : > { %v273_v5 = vld [vmem:[%s1825_s23 + $0xc0] sm:$0xff]  ;;  %v275_v6 = vld [vmem:[%s1825_s23 + $0xd0] sm:$0xff]  ;;  %v407_v7 = vpack.c.bf16 %v311_v4, %v309_v2  ;;  %1602 = vset.pattern.permute.xlu2 %v1730_v14  ;;  %v1880_v44 = vld [vmem:[%s2677_s3 + $0x8] sm:$0xff] }
  0x20   : > { %v305_v8 = vld [vmem:[%s1825_s23 + $0x1c0] sm:$0xff]  ;;  %v307_v9 = vld [vmem:[%s1825_s23 + $0x1d0] sm:$0xff]  ;;  %1517 = vmatpush.bf16.msra.mxu2 %v391_v3  ;;  %v389_v10 = vpack.c.bf16 %v275_v6, %v273_v5  ;;  %571 = vmatpush.bf16.msra.mxu0 %v391_v3  ;;  %v1731_v5 = vmov 1   ;;  %s2704_s18 = smov (!%p239_p13, %s1718_s18), 1 }
  0x21   : > { %1525 = vmatpush.bf16.msra.mxu3 %v407_v7  ;;  %v405_v11 = vpack.c.bf16 %v307_v9, %v305_v8  ;;  %v269_v12 = vld [vmem:[%s1825_s23 + $0xa0] sm:$0xff]  ;;  %v271_v13 = vld [vmem:[%s1825_s23 + $0xb0] sm:$0xff]  ;;  %599 = vmatpush.bf16.msra.mxu1 %v407_v7  ;;  %s1533_s13 = smul.u32 112, %s2704_s18 }
  0x22   : > { %v301_v15 = vld [vmem:[%s1825_s23 + $0x1a0] sm:$0xff]  ;;  %v303_v16 = vld [vmem:[%s1825_s23 + $0x1b0] sm:$0xff]  ;;  %v387_v17 = vpack.c.bf16 %v271_v13, %v269_v12 }
  0x23   : > { %v403_v18 = vpack.c.bf16 %v303_v16, %v301_v15  ;;  %v265_v19 = vld [vmem:[%s1825_s23 + $0x80] sm:$0xff]  ;;  %v267_v20 = vld [vmem:[%s1825_s23 + $0x90] sm:$0xff]  ;;  %s2600_s15 = scalar_lea.vmem %s2678_s4, %s1533_s13 }
  0x24   : > { %1518 = vmatpush.bf16.msra.mxu2 %v389_v10  ;;  %572 = vmatpush.bf16.msra.mxu0 %v389_v10  ;;  %v297_v21 = vld [vmem:[%s1825_s23 + $0x180] sm:$0xff]  ;;  %v299_v22 = vld [vmem:[%s1825_s23 + $0x190] sm:$0xff]  ;;  %v385_v23 = vpack.c.bf16 %v267_v20, %v265_v19  ;;  %v1948_v19 = vld [vmem:[%s2677_s3 + $0x28] sm:$0xff] }
  0x25   : > { %1526 = vmatpush.bf16.msra.mxu3 %v405_v11  ;;  %600 = vmatpush.bf16.msra.mxu1 %v405_v11  ;;  %v401_v24 = vpack.c.bf16 %v299_v22, %v297_v21  ;;  %v261_v25 = vld [vmem:[%s1825_s23 + $0x60] sm:$0xff]  ;;  %v263_v26 = vld [vmem:[%s1825_s23 + $0x70] sm:$0xff] }
  0x26   : > { %v293_v27 = vld [vmem:[%s1825_s23 + $0x160] sm:$0xff]  ;;  %v295_v28 = vld [vmem:[%s1825_s23 + $0x170] sm:$0xff]  ;;  %v383_v30 = vpack.c.bf16 %v263_v26, %v261_v25 }
  0x27   : > { %v1854_v29 = vld [vmem:[%s2677_s3 + $0x10] sm:$0xff]  ;;  %v399_v31 = vpack.c.bf16 %v295_v28, %v293_v27  ;;  %v257_v32 = vld [vmem:[%s1825_s23 + $0x40] sm:$0xff] }
  0x28   : > { %1519 = vmatpush.bf16.msra.mxu2 %v387_v17  ;;  %573 = vmatpush.bf16.msra.mxu0 %v387_v17  ;;  %v259_v33 = vld [vmem:[%s1825_s23 + $0x50] sm:$0xff]  ;;  %v1862_v34 = vld [vmem:[%s2677_s3] sm:$0xff] }
  0x29   : > { %1527 = vmatpush.bf16.msra.mxu3 %v403_v18  ;;  %601 = vmatpush.bf16.msra.mxu1 %v403_v18  ;;  %v289_v35 = vld [vmem:[%s1825_s23 + $0x140] sm:$0xff]  ;;  %v291_v36 = vld [vmem:[%s1825_s23 + $0x150] sm:$0xff]  ;;  %v381_v37 = vpack.c.bf16 %v259_v33, %v257_v32  ;;  %v1732_v33 = vmov 2  }
  0x2a   : > { %474 = vperm.xlu1 %1601, %v1854_v29   ;;  %464 = vperm.xlu0 %1600, %v1862_v34   ;;  %v397_v39 = vpack.c.bf16 %v291_v36, %v289_v35  ;;  %v253_v40 = vld [vmem:[%s1825_s23 + $0x20] sm:$0xff]  ;;  %v255_v41 = vld [vmem:[%s1825_s23 + $0x30] sm:$0xff] }
  0x2b   : > { %v285_v42 = vld [vmem:[%s1825_s23 + $0x120] sm:$0xff]  ;;  %v287_v43 = vld [vmem:[%s1825_s23 + $0x130] sm:$0xff]  ;;  %v379_v45 = vpack.c.bf16 %v255_v41, %v253_v40 }
  0x2c   : > { %1520 = vmatpush.bf16.msra.mxu2 %v385_v23  ;;  %574 = vmatpush.bf16.msra.mxu0 %v385_v23  ;;  %v249_v46 = vld [vmem:[%s1825_s23] sm:$0xff]  ;;  %v395_v47 = vpack.c.bf16 %v287_v43, %v285_v42  ;;  %v251_v48 = vld [vmem:[%s1825_s23 + $0x10] sm:$0xff] }
  0x2d   : > { %1528 = vmatpush.bf16.msra.mxu3 %v401_v24  ;;  %602 = vmatpush.bf16.msra.mxu1 %v401_v24  ;;  %v281_v49 = vld [vmem:[%s1825_s23 + $0x100] sm:$0xff]  ;;  %v283_v50 = vld [vmem:[%s1825_s23 + $0x110] sm:$0xff]  ;;  %v377_v56 = vpack.c.bf16 %v251_v48, %v249_v46  ;;  %v280_v46 = vld [vmem:[%s1825_s23 + $0xf8] sm:$0xff] }
  0x2e   : > { %v341_v51 = vld [vmem:[%s1825_s23 + $0x2e0] sm:$0xff]  ;;  %v343_v52 = vld [vmem:[%s1825_s23 + $0x2f0] sm:$0xff]  ;;  %v393_v59 = vpack.c.bf16 %v283_v50, %v281_v49 }
  0x2f   : > { %v1892_v53 = vld [vmem:[%s2677_s3 + $0x20] sm:$0xff]  ;;  %v375_v55 = vld [vmem:[%s1825_s23 + $0x3f0] sm:$0xff]  ;;  %v423_v62 = vpack.c.bf16 %v343_v52, %v341_v51  ;;  %v310_v52 = vld [vmem:[%s1825_s23 + $0x1e8] sm:$0xff] }
  0x30   : > { %1521 = vmatpush.bf16.msra.mxu2 %v383_v30  ;;  %575 = vmatpush.bf16.msra.mxu0 %v383_v30  ;;  %v373_v54 = vld [vmem:[%s1825_s23 + $0x3e0] sm:$0xff]  ;;  %v1512_v58 = vld [vmem:[%s2675_s1 + $0x4c] sm:$0xf0]  ;;  %v1465_v61 = vld [vmem:[%s2675_s1 + $0x50] sm:$0xf0] }
  0x31   : > { %1529 = vmatpush.bf16.msra.mxu3 %v399_v31  ;;  %603 = vmatpush.bf16.msra.mxu1 %v399_v31  ;;  %v1463_v57 = vld [vmem:[%s2675_s1 + $0x40] sm:$0xf]  ;;  %v1510_v60 = vld [vmem:[%s2675_s1 + $0x44] sm:$0xf]  ;;  %v439_v63 = vpack.c.bf16 %v375_v55, %v373_v54  ;;  %v339_v1 = vld [vmem:[%s1825_s23 + $0x2d0] sm:$0xff] }
  0x32   : > { %479 = vperm.xlu1 %1601, %v1870_v38   ;;  %469 = vperm.xlu0 %1600, %v1880_v44   ;;  %v337_v0 = vld [vmem:[%s1825_s23 + $0x2c0] sm:$0xff]  ;;  %v1911_v2 = vor.u32 %v1512_v58, %v1463_v57  ;;  %v371_v4 = vld [vmem:[%s1825_s23 + $0x3d0] sm:$0xff]  ;;  %v1921_v7 = vor.u32 %v1510_v60, %v1465_v61  ;;  %v312_v54 = vld [vmem:[%s1825_s23 + $0x1f8] sm:$0xff] }
  0x33   : > { %484 = vperm.xlu2 %1602, %v1892_v53   ;;  %v369_v3 = vld [vmem:[%s1825_s23 + $0x3c0] sm:$0xff]  ;;  %v1919_v6 = vld [vmem:[%s2677_s3 + $0x30] sm:$0xff]  ;;  %v421_v8 = vpack.c.bf16 %v339_v1, %v337_v0  ;;  %v408_v58 = vpack.c.bf16 %v312_v54, %v310_v52  ;;  %v274_v61 = vld [vmem:[%s1825_s23 + $0xc8] sm:$0xff] }
  0x34   : > { %1522 = vmatpush.bf16.msra.mxu2 %v381_v37  ;;  %576 = vmatpush.bf16.msra.mxu0 %v381_v37  ;;  %v437_v9 = vpack.c.bf16 %v371_v4, %v369_v3  ;;  %v333_v10 = vld [vmem:[%s1825_s23 + $0x2a0] sm:$0xff]  ;;  %v335_v11 = vld [vmem:[%s1825_s23 + $0x2b0] sm:$0xff]  ;;  %v294_v54 = vld [vmem:[%s1825_s23 + $0x168] sm:$0xff] }
  0x35   : > { %1530 = vmatpush.bf16.msra.mxu3 %v397_v39  ;;  %604 = vmatpush.bf16.msra.mxu1 %v397_v39  ;;  %v365_v12 = vld [vmem:[%s1825_s23 + $0x3a0] sm:$0xff]  ;;  %v367_v13 = vld [vmem:[%s1825_s23 + $0x3b0] sm:$0xff]  ;;  %v419_v20 = vpack.c.bf16 %v335_v11, %v333_v10  ;;  %v306_v10 = vld [vmem:[%s1825_s23 + $0x1c8] sm:$0xff] }
  0x36   : > { %v1431_v14 = vld [vmem:[%s2675_s1] sm:$0xf]  ;;  %v1504_v15 = vld [vmem:[%s2675_s1 + $0xc] sm:$0xf0]  ;;  %v1502_v17 = vld [vmem:[%s2675_s1 + $0x4] sm:$0xf]  ;;  %v435_v22 = vpack.c.bf16 %v367_v13, %v365_v12 }
  0x37   : > { %v1937_v16 = vor.u32 %v1504_v15, %v1431_v14  ;;  %v1433_v18 = vld [vmem:[%s2675_s1 + $0x10] sm:$0xf0]  ;;  %v329_v23 = vld [vmem:[%s1825_s23 + $0x280] sm:$0xff]  ;;  %v1508_v1 = vld [vmem:[%s2675_s1 + $0x2c] sm:$0xf0] }
  0x38   : > { %1523 = vmatpush.bf16.msra.mxu2 %v379_v45  ;;  %577 = vmatpush.bf16.msra.mxu0 %v379_v45  ;;  %v1950_v21 = vor.u32 %v1502_v17, %v1433_v18  ;;  %v331_v24 = vld [vmem:[%s1825_s23 + $0x290] sm:$0xff]  ;;  %v361_v25 = vld [vmem:[%s1825_s23 + $0x380] sm:$0xff]  ;;  %v278_v45 = vld [vmem:[%s1825_s23 + $0xe8] sm:$0xff] }
  0x39   : > { %1531 = vmatpush.bf16.msra.mxu3 %v395_v47  ;;  %605 = vmatpush.bf16.msra.mxu1 %v395_v47  ;;  %v363_v26 = vld [vmem:[%s1825_s23 + $0x390] sm:$0xff]  ;;  %v460_v27 = vld [vmem:[%s2675_s1 + $0x60] sm:$0xff]  ;;  %v417_v28 = vpack.c.bf16 %v331_v24, %v329_v23  ;;  %v392_v50 = vpack.c.bf16 %v280_v46, %v278_v45  ;;  %v308_v13 = vld [vmem:[%s1825_s23 + $0x1d8] sm:$0xff] }
  0x3a   : > { %1603 = vset.pattern.permute.xlu1 %v1731_v5  ;;  %494 = vperm.xlu0 %1600, %v1919_v6   ;;  %v433_v30 = vpack.c.bf16 %v363_v26, %v361_v25  ;;  %v325_v31 = vld [vmem:[%s1825_s23 + $0x260] sm:$0xff]  ;;  %v327_v32 = vld [vmem:[%s1825_s23 + $0x270] sm:$0xff]  ;;  %v535_v35 = vunpack.c.l.b16 %v460_v27  ;;  %v536_v39 = vunpack.c.h.b16 %v460_v27  ;;  %v270_v14 = vld [vmem:[%s1825_s23 + $0xa8] sm:$0xff]  ;;  %v406_v24 = vpack.c.bf16 %v308_v13, %v306_v10 }
  0x3b   : > { %796 = vperm.xlu1 %1603, %v1862_v34   ;;  %489 = vperm.xlu2 %1602, %v1948_v19   ;;  %v357_v36 = vld [vmem:[%s1825_s23 + $0x360] sm:$0xff]  ;;  %v359_v37 = vld [vmem:[%s1825_s23 + $0x370] sm:$0xff]  ;;  %v415_v40 = vpack.c.bf16 %v327_v32, %v325_v31  ;;  %v272_v15 = vld [vmem:[%s1825_s23 + $0xb8] sm:$0xff] }
  0x3c   : > { %1524 = vmatpush.bf16.msra.mxu2 %v377_v56  ;;  %578 = vmatpush.bf16.msra.mxu0 %v377_v56  ;;  %v321_v41 = vld [vmem:[%s1825_s23 + $0x240] sm:$0xff]  ;;  %v431_v42 = vpack.c.bf16 %v359_v37, %v357_v36  ;;  %v323_v43 = vld [vmem:[%s1825_s23 + $0x250] sm:$0xff]  ;;  %v1975_v47 = vpack.c.b16 %v535_v35, %v535_v35  ;;  %v1979_v51 = vpack.c.b16 %v536_v39, %v536_v39  ;;  %v302_v26 = vld [vmem:[%s1825_s23 + $0x1a8] sm:$0xff] }
  0x3d   : > { %1532 = vmatpush.bf16.msra.mxu3 %v393_v59  ;;  %606 = vmatpush.bf16.msra.mxu1 %v393_v59  ;;  %v353_v48 = vld [vmem:[%s1825_s23 + $0x340] sm:$0xff]  ;;  %v355_v49 = vld [vmem:[%s1825_s23 + $0x350] sm:$0xff]  ;;  %v413_v55 = vpack.c.bf16 %v323_v43, %v321_v41  ;;  %v388_v25 = vpack.c.bf16 %v272_v15, %v270_v14  ;;  %v304_v27 = vld [vmem:[%s1825_s23 + $0x1b8] sm:$0xff] }
  0x3e   : > { %v317_v56 = vld [vmem:[%s1825_s23 + $0x220] sm:$0xff]  ;;  %v319_v57 = vld [vmem:[%s1825_s23 + $0x230] sm:$0xff]  ;;  %v429_v59 = vpack.c.bf16 %v355_v49, %v353_v48  ;;  %v404_v35 = vpack.c.bf16 %v304_v27, %v302_v26  ;;  %v1439_v37 = vld [vmem:[%s2675_s1 + $0x8] sm:$0xf] }
  0x3f   : > { %589 = vmatmul.bf16.vlgmr.msra.gmra.mxu2 %v1911_v2  ;;  %579 = vmatmul.bf16.vlgmr.msra.gmra.mxu0 %v1937_v16  ;;  %v349_v60 = vld [vmem:[%s1825_s23 + $0x320] sm:$0xff]  ;;  %v411_v11 = vpack.c.bf16 %v319_v57, %v317_v56  ;;  %v347_v23 = vld [vmem:[%s1825_s23 + $0x310] sm:$0xff]  ;;  %v1505_v39 = vld [vmem:[%s2675_s1 + $0x14] sm:$0xf0] }
  0x40   : > { %627 = vmatpush.bf16.msrb.mxu2 %v423_v62  ;;  %617 = vmatmul.bf16.vlgmr.msra.gmra.mxu3 %v1921_v7  ;;  %v276_v62 = vld [vmem:[%s1825_s23 + $0xd8] sm:$0xff]  ;;  %v1447_v0 = vld [vmem:[%s2675_s1 + $0x20] sm:$0xf]  ;;  %v262_v45 = vld [vmem:[%s1825_s23 + $0x68] sm:$0xff]  ;;  %v2046_v48 = vor.u32 %v1505_v39, %v1439_v37 }
  0x41   : > { %655 = vmatpush.bf16.msrb.mxu3 %v439_v63  ;;  %607 = vmatmul.bf16.vlgmr.msra.gmra.mxu1 %v1950_v21  ;;  %v351_v63 = vld [vmem:[%s1825_s23 + $0x330] sm:$0xff]  ;;  %v390_v3 = vpack.c.bf16 %v276_v62, %v274_v61  ;;  %v2001_v4 = vor.u32 %v1508_v1, %v1447_v0  ;;  %v313_v18 = vld [vmem:[%s1825_s23 + $0x200] sm:$0xff]  ;;  %v1441_v41 = vld [vmem:[%s2675_s1 + $0x18] sm:$0xf0] }
  0x42   : > { %1605 = vset.pattern.permute.xlu0 %v1732_v33  ;;  %683 = vmatpush.bf16.msrb.mxu0 %v392_v50  ;;  %v427_v17 = vpack.c.bf16 %v351_v63, %v349_v60  ;;  %v300_v43 = vld [vmem:[%s1825_s23 + $0x198] sm:$0xff]  ;;  %v342_v56 = vld [vmem:[%s1825_s23 + $0x2e8] sm:$0xff] }
  0x43   : > { %812 = vperm.xlu1 %1603, %v1892_v53   ;;  %862 = vperm.xlu0 %1605, %v1919_v6   ;;  %v264_v46 = vld [vmem:[%s1825_s23 + $0x78] sm:$0xff]  ;;  %v258_v61 = vld [vmem:[%s1825_s23 + $0x48] sm:$0xff] }
  0x44   : > { %628 = vmatpush.bf16.msrb.mxu2 %v421_v8  ;;  %1604 = vset.pattern.permute.xlu2 %v1731_v5  ;;  %v1506_v8 = vld [vmem:[%s2675_s1 + $0x24] sm:$0xf]  ;;  %v384_v52 = vpack.c.bf16 %v264_v46, %v262_v45  ;;  %v344_v57 = vld [vmem:[%s1825_s23 + $0x2f8] sm:$0xff]  ;;  %v338_v0 = vld [vmem:[%s1825_s23 + $0x2c8] sm:$0xff] }
  0x45   : > { %656 = vmatpush.bf16.msrb.mxu3 %v437_v9  ;;  %820 = vperm.xlu2 %1604, %v1919_v6   ;;  %v1449_v9 = vld [vmem:[%s2675_s1 + $0x30] sm:$0xf0]  ;;  %v376_v60 = vld [vmem:[%s1825_s23 + $0x3f8] sm:$0xff]  ;;  %v334_v15 = vld [vmem:[%s1825_s23 + $0x2a8] sm:$0xff] }
  0x46   : > { %v2010_v12 = vor.u32 %v1506_v8, %v1449_v9  ;;  %711 = vmatpush.bf16.msrb.mxu1 %v408_v58  ;;  %684 = vmatpush.bf16.msrb.mxu0 %v390_v3  ;;  %v374_v58 = vld [vmem:[%s1825_s23 + $0x3e8] sm:$0xff]  ;;  %v260_v62 = vld [vmem:[%s1825_s23 + $0x58] sm:$0xff] }
  0x47   : > { %v340_v1 = vld [vmem:[%s1825_s23 + $0x2d8] sm:$0xff]  ;;  %v370_v3 = vld [vmem:[%s1825_s23 + $0x3c8] sm:$0xff]  ;;  %v382_v10 = vpack.c.bf16 %v260_v62, %v258_v61 }
  0x48   : > { %629 = vmatpush.bf16.msrb.mxu2 %v419_v20  ;;  %v315_v20 = vld [vmem:[%s1825_s23 + $0x210] sm:$0xff]  ;;  %v422_v8 = vpack.c.bf16 %v340_v1, %v338_v0  ;;  %v372_v9 = vld [vmem:[%s1825_s23 + $0x3d8] sm:$0xff]  ;;  %v286_v27 = vld [vmem:[%s1825_s23 + $0x128] sm:$0xff] }
  0x49   : > { %657 = vmatpush.bf16.msrb.mxu3 %v435_v22  ;;  %v345_v22 = vld [vmem:[%s1825_s23 + $0x300] sm:$0xff]  ;;  %v409_v31 = vpack.c.bf16 %v315_v20, %v313_v18  ;;  %v292_v13 = vld [vmem:[%s1825_s23 + $0x158] sm:$0xff]  ;;  %v438_v14 = vpack.c.bf16 %v372_v9, %v370_v3  ;;  %v366_v18 = vld [vmem:[%s1825_s23 + $0x3a8] sm:$0xff] }
  0x4a   : > { %v425_v32 = vpack.c.bf16 %v347_v23, %v345_v22  ;;  %712 = vmatpush.bf16.msrb.mxu1 %v406_v24  ;;  %685 = vmatpush.bf16.msrb.mxu0 %v388_v25  ;;  %v368_v20 = vld [vmem:[%s1825_s23 + $0x3b8] sm:$0xff]  ;;  %v254_v22 = vld [vmem:[%s1825_s23 + $0x28] sm:$0xff] }
  0x4b   : > { %1606 = vset.pattern.permute.xlu1 %v1732_v33  ;;  %1608 = vset.pattern.permute.xlu0 %v1731_v5  ;;  %v256_v23 = vld [vmem:[%s1825_s23 + $0x38] sm:$0xff]  ;;  %v362_v37 = vld [vmem:[%s1825_s23 + $0x388] sm:$0xff] }
  0x4c   : > { %630 = vmatpush.bf16.msrb.mxu2 %v417_v28  ;;  %854 = vperm.xlu1 %1606, %v1892_v53   ;;  %v266_v28 = vld [vmem:[%s1825_s23 + $0x88] sm:$0xff]  ;;  %v380_v26 = vpack.c.bf16 %v256_v23, %v254_v22  ;;  %v364_v39 = vld [vmem:[%s1825_s23 + $0x398] sm:$0xff] }
  0x4d   : > { %658 = vmatpush.bf16.msrb.mxu3 %v433_v30  ;;  %804 = vperm.xlu0 %1608, %v1854_v29   ;;  %v268_v30 = vld [vmem:[%s1825_s23 + $0x98] sm:$0xff]  ;;  %v358_v61 = vld [vmem:[%s1825_s23 + $0x368] sm:$0xff] }
  0x4e   : > { %816 = vperm.xlu2 %1604, %v1948_v19   ;;  %v386_v36 = vpack.c.bf16 %v268_v30, %v266_v28  ;;  %713 = vmatpush.bf16.msrb.mxu1 %v404_v35  ;;  %v288_v28 = vld [vmem:[%s1825_s23 + $0x138] sm:$0xff]  ;;  %v330_v30 = vld [vmem:[%s1825_s23 + $0x288] sm:$0xff] }
  0x4f   : > { %594 = vmatmul.bf16.gmra.mxu2 %v1975_v47  ;;  %584 = vmatmul.bf16.gmra.mxu0 %v2001_v4  ;;  %v250_v35 = vld [vmem:[%s1825_s23 + $0x8] sm:$0xff]  ;;  %v1457_v45 = vld [vmem:[%s2675_s1 + $0x38] sm:$0xf0] }
  0x50   : > { %631 = vmatpush.bf16.msrb.mxu2 %v415_v40  ;;  %622 = vmatmul.bf16.gmra.mxu3 %v1979_v51  ;;  %v1503_v40 = vld [vmem:[%s2675_s1 + $0xc] sm:$0xf]  ;;  %v324_v1 = vld [vmem:[%s1825_s23 + $0x258] sm:$0xff]  ;;  %v1471_v23 = vld [vmem:[%s2675_s1 + $0x48] sm:$0xf] }
  0x51   : > { %659 = vmatpush.bf16.msrb.mxu3 %v431_v42  ;;  %612 = vmatmul.bf16.gmra.mxu1 %v2010_v12  ;;  %v298_v42 = vld [vmem:[%s1825_s23 + $0x188] sm:$0xff]  ;;  %v2048_v49 = vor.u32 %v1503_v40, %v1441_v41  ;;  %v1509_v41 = vld [vmem:[%s2675_s1 + $0x34] sm:$0xf0] }
  0x52   : > { %686 = vmatpush.bf16.msrb.mxu0 %v386_v36  ;;  %v402_v50 = vpack.c.bf16 %v300_v43, %v298_v42  ;;  %v252_v36 = vld [vmem:[%s1825_s23 + $0x18] sm:$0xff]  ;;  %v1455_v40 = vld [vmem:[%s2675_s1 + $0x28] sm:$0xf]  ;;  %v1507_v42 = vld [vmem:[%s2675_s1 + $0x2c] sm:$0xf]  ;;  %v396_v43 = vpack.c.bf16 %v288_v28, %v286_v27 }
  0x53   : > { %v322_v0 = vld [vmem:[%s1825_s23 + $0x248] sm:$0xff] }
  0x54   : > { %632 = vmatpush.bf16.msrb.mxu2 %v413_v55  ;;  %1609 = vset.pattern.permute.xlu1 %v1731_v5  ;;  %v296_v55 = vld [vmem:[%s1825_s23 + $0x178] sm:$0xff]  ;;  %v354_v3 = vld [vmem:[%s1825_s23 + $0x348] sm:$0xff] }
  0x55   : > { %660 = vmatpush.bf16.msrb.mxu3 %v429_v59  ;;  %808 = vperm.xlu1 %1609, %v1870_v38   ;;  %v424_v59 = vpack.c.bf16 %v344_v57, %v342_v56  ;;  %v400_v63 = vpack.c.bf16 %v296_v55, %v294_v54  ;;  %v284_v54 = vld [vmem:[%s1825_s23 + $0x118] sm:$0xff]  ;;  %v434_v55 = vpack.c.bf16 %v364_v39, %v362_v37  ;;  %v346_v22 = vld [vmem:[%s1825_s23 + $0x308] sm:$0xff] }
  0x56   : > { %1612 = vset.pattern.permute.xlu0 %v1732_v33  ;;  %1607 = vset.pattern.permute.xlu2 %v1732_v33  ;;  %v2100_v56 = vor.u32 %v1509_v41, %v1455_v40  ;;  %v2102_v57 = vor.u32 %v1507_v42, %v1457_v45 }
  0x57   : > { %838 = vperm.xlu0 %1612, %v1862_v34   ;;  %858 = vperm.xlu2 %1607, %v1948_v19  }
  0x58   : > { %633 = vmatpush.bf16.msrb.mxu2 %v411_v11  ;;  %714 = vmatpush.bf16.msrb.mxu1 %v402_v50  ;;  %v290_v11 = vld [vmem:[%s1825_s23 + $0x148] sm:$0xff]  ;;  %v378_v50 = vpack.c.bf16 %v252_v36, %v250_v35 }
  0x59   : > { %661 = vmatpush.bf16.msrb.mxu3 %v427_v17  ;;  %687 = vmatpush.bf16.msrb.mxu0 %v384_v52  ;;  %v336_v17 = vld [vmem:[%s1825_s23 + $0x2b8] sm:$0xff]  ;;  %v398_v24 = vpack.c.bf16 %v292_v13, %v290_v11  ;;  %v282_v52 = vld [vmem:[%s1825_s23 + $0x108] sm:$0xff] }
  0x5a   : > { %v420_v25 = vpack.c.bf16 %v336_v17, %v334_v15  ;;  %v320_v11 = vld [vmem:[%s1825_s23 + $0x238] sm:$0xff]  ;;  %v350_v13 = vld [vmem:[%s1825_s23 + $0x328] sm:$0xff] }
  0x5c   : > { %634 = vmatpush.bf16.msrb.mxu2 %v409_v31  ;;  %715 = vmatpush.bf16.msrb.mxu1 %v400_v63  ;;  %v436_v31 = vpack.c.bf16 %v368_v20, %v366_v18  ;;  %v314_v18 = vld [vmem:[%s1825_s23 + $0x208] sm:$0xff]  ;;  %v316_v20 = vld [vmem:[%s1825_s23 + $0x218] sm:$0xff] }
  0x5d   : > { %662 = vmatpush.bf16.msrb.mxu3 %v425_v32  ;;  %1610 = vset.pattern.permute.xlu1 %v1732_v33  ;;  %v440_v33 = vpack.c.bf16 %v376_v60, %v374_v58  ;;  %v332_v32 = vld [vmem:[%s1825_s23 + $0x298] sm:$0xff]  ;;  %v394_v58 = vpack.c.bf16 %v284_v54, %v282_v52 }
  0x5e   : > { %850 = vperm.xlu1 %1610, %v1870_v38   ;;  %688 = vmatpush.bf16.msrb.mxu0 %v382_v10  ;;  %v418_v46 = vpack.c.bf16 %v332_v32, %v330_v30  ;;  %v328_v60 = vld [vmem:[%s1825_s23 + $0x278] sm:$0xff]  ;;  %v318_v10 = vld [vmem:[%s1825_s23 + $0x228] sm:$0xff] }
  0x5f   : > { %635 = vmatmul.bf16.vlgmr.msrb.gmra.mxu2 %v2046_v48  ;;  %846 = vperm.xlu2 %1607, %v1854_v29   ;;  %v412_v15 = vpack.c.bf16 %v320_v11, %v318_v10 }
  0x60   : > { %663 = vmatmul.bf16.vlgmr.msrb.gmra.mxu3 %v2048_v49  ;;  %739 = vmatpush.bf16.msra.mxu2 %v424_v59  ;;  %v326_v59 = vld [vmem:[%s1825_s23 + $0x268] sm:$0xff] }
  0x61   : > { %767 = vmatpush.bf16.msra.mxu3 %v440_v33  ;;  %716 = vmatpush.bf16.msrb.mxu1 %v398_v24  ;;  %v416_v62 = vpack.c.bf16 %v328_v60, %v326_v59  ;;  %v360_v33 = vld [vmem:[%s1825_s23 + $0x378] sm:$0xff] }
  0x62   : > { %689 = vmatpush.bf16.msrb.mxu0 %v380_v26  ;;  %v432_v63 = vpack.c.bf16 %v360_v33, %v358_v61  ;;  %v1513_v24 = vld [vmem:[%s2675_s1 + $0x54] sm:$0xf0]  ;;  %v410_v26 = vpack.c.bf16 %v316_v20, %v314_v18 }
  0x63   : > { %v1472_v28 = vor.u32 %v1513_v24, %v1471_v23 }
  0x64   : > { %740 = vmatpush.bf16.msra.mxu2 %v422_v8  ;;  %v356_v8 = vld [vmem:[%s1825_s23 + $0x358] sm:$0xff] }
  0x65   : > { %768 = vmatpush.bf16.msra.mxu3 %v438_v14  ;;  %717 = vmatpush.bf16.msrb.mxu1 %v396_v43  ;;  %v430_v9 = vpack.c.bf16 %v356_v8, %v354_v3  ;;  %v352_v14 = vld [vmem:[%s1825_s23 + $0x338] sm:$0xff] }
  0x66   : > { %842 = vperm.xlu1 %1610, %v1880_v44   ;;  %690 = vmatpush.bf16.msrb.mxu0 %v378_v50  ;;  %v428_v17 = vpack.c.bf16 %v352_v14, %v350_v13 }
  0x67   : > { %1611 = vset.pattern.permute.xlu2 %v1731_v5  ;;  %v414_v5 = vpack.c.bf16 %v324_v1, %v322_v0 }
  0x68   : > { %741 = vmatpush.bf16.msra.mxu2 %v420_v25  ;;  %800 = vperm.xlu2 %1611, %v1880_v44   ;;  %v1473_v25 = vld [vmem:[%s2675_s1 + $0x58] sm:$0xf0] }
  0x69   : > { %769 = vmatpush.bf16.msra.mxu3 %v436_v31  ;;  %718 = vmatpush.bf16.msrb.mxu1 %v394_v58  ;;  %v461_v31 = vld [vmem:[%s2675_s1 + $0x68] sm:$0xff] }
  0x6a   : > { %691 = vmatmul.bf16.vlgmr.msrb.gmra.mxu0 %v1937_v16  ;;  %v348_v16 = vld [vmem:[%s1825_s23 + $0x318] sm:$0xff]  ;;  %v537_v32 = vunpack.c.l.b16 %v461_v31  ;;  %v538_v35 = vunpack.c.h.b16 %v461_v31 }
  0x6b   : > { %v426_v27 = vpack.c.bf16 %v348_v16, %v346_v22 }
  0x6c   : > { %742 = vmatpush.bf16.msra.mxu2 %v418_v46  ;;  %719 = vmatmul.bf16.vlgmr.msrb.gmra.mxu1 %v1950_v21  ;;  %v1511_v21 = vld [vmem:[%s2675_s1 + $0x4c] sm:$0xf]  ;;  %v553_v36 = vpack.c.b16 %v537_v32, %v537_v32  ;;  %v554_v37 = vpack.c.b16 %v538_v35, %v538_v35 }
  0x6d   : > { %770 = vmatpush.bf16.msra.mxu3 %v434_v55  ;;  %v1476_v30 = vor.u32 %v1511_v21, %v1473_v25 }
  0x6f   : > { %640 = vmatmul.bf16.gmra.mxu2 %v2100_v56 }
  0x70   : > { %668 = vmatmul.bf16.gmra.mxu3 %v2102_v57  ;;  %743 = vmatpush.bf16.msra.mxu2 %v416_v62 }
  0x71   : > { %771 = vmatpush.bf16.msra.mxu3 %v432_v63 }
  0x74   : > { %744 = vmatpush.bf16.msra.mxu2 %v414_v5 }
  0x75   : > { %772 = vmatpush.bf16.msra.mxu3 %v430_v9 }
  0x78   : > { %745 = vmatpush.bf16.msra.mxu2 %v412_v15 }
  0x79   : > { %773 = vmatpush.bf16.msra.mxu3 %v428_v17 }
  0x7a   : > { %696 = vmatmul.bf16.gmra.mxu0 %v2001_v4 }
  0x7c   : > { %746 = vmatpush.bf16.msra.mxu2 %v410_v26  ;;  %724 = vmatmul.bf16.gmra.mxu1 %v2010_v12  ;;  %v1733_v26 = vmov 3  }
  0x7d   : > { %774 = vmatpush.bf16.msra.mxu3 %v426_v27  ;;  %1614 = vset.pattern.permute.xlu1 %v1733_v26 }
  0x7e   : > { %1613 = vset.pattern.permute.xlu2 %v1733_v26  ;;  %913 = vperm.xlu1 %1614, %v1880_v44  }
  0x7f   : > { %645 = vmatmul.bf16.gmra.mxu2 %v1472_v28  ;;  %909 = vperm.xlu2 %1613, %v1862_v34  }
  0x80   : > { %673 = vmatmul.bf16.gmra.mxu3 %v1476_v30  ;;  %1615 = vset.pattern.permute.xlu0 %v1733_v26 }
  0x81   : > { %921 = vperm.xlu0 %1615, %v1870_v38  }
  0x86   : > { %925 = vperm.xlu1 %1614, %v1892_v53  }
  0x87   : > { %917 = vperm.xlu2 %1613, %v1854_v29  }
  0x8a   : > { %701 = vmatmul.bf16.gmra.mxu0 %v1911_v2 }
  0x8c   : > { %729 = vmatmul.bf16.gmra.mxu1 %v1921_v7 }
  0x8d   : > { %v2151_v39 = vpop.permute.xlu2 %484 }
  0x8e   : > { %933 = vperm.xlu1 %1614, %v1919_v6  }
  0x8f   : > { %650 = vmatmul.bf16.gmra.mxu2 %v553_v36  ;;  %929 = vperm.xlu2 %1613, %v1948_v19  }
  0x90   : > { %678 = vmatmul.bf16.gmra.mxu3 %v554_v37 }
  0x95   : > { %v2158_v46 = vpop.permute.xlu2 %489 }
  0x9a   : > { %706 = vmatmul.bf16.gmra.mxu0 %v1975_v47 }
  0x9c   : > { %734 = vmatmul.bf16.gmra.mxu1 %v1979_v51  ;;  %v465_v4 = vpop.permute.xlu0 %464  ;;  %v475_v59 = vpop.permute.xlu1 %474 }
  0x9f   : > { %747 = vmatmul.bf16.vlgmr.msra.gmra.mxu2 %v2046_v48  ;;  %v2177_v15 = vpop.permute.xlu2 %820 }
  0xa0   : > { %775 = vmatmul.bf16.vlgmr.msra.gmra.mxu3 %v2048_v49 }
  0xa4   : > { %v470_v51 = vpop.permute.xlu0 %469  ;;  %v480_v0 = vpop.permute.xlu1 %479 }
  0xa8   : > { %v2185_v27 = vpop.permute.xlu2 %816 }
  0xad   : > { %v2175_v10 = vpop.permute.xlu1 %796 }
  0xaf   : > { %752 = vmatmul.bf16.gmra.mxu2 %v2100_v56 }
  0xb0   : > { %780 = vmatmul.bf16.gmra.mxu3 %v2102_v57 }
  0xb5   : > { %v2183_v16 = vpop.permute.xlu1 %812 }
  0xbc   : > { %v580_v12 = vpop.f32.mrf.mxu0 }
  0xbd   : > { %v581_v2 = vadd.f32 %v580_v12, %v465_v4 }
  0xbe   : > { %v608_v7 = vpop.f32.mrf.mxu1  ;;  %v2192_v35 = vpop.permute.xlu1 %854 }
  0xbf   : > { %757 = vmatmul.bf16.gmra.mxu2 %v1472_v28  ;;  %v2153_v48 = vadd.f32 %v608_v7, %v581_v2  ;;  %v2200_v7 = vpop.permute.xlu2 %858 }
  0xc0   : > { %785 = vmatmul.bf16.gmra.mxu3 %v1476_v30 }
  0xc2   : > { %v590_v40 = vpop.f32.mrf.mxu2 }
  0xc3   : > { %v591_v49 = vadd.f32 %v590_v40, %v2151_v39  ;;  %v618_v47 = vpop.f32.mrf.mxu3 }
  0xc4   : > { %v582_v42 = vpop.f32.mrf.mxu0 }
  0xc5   : > { %v2156_v41 = vadd.f32 %v618_v47, %v591_v49  ;;  %v583_v43 = vadd.f32 %v582_v42, %v470_v51 }
  0xc6   : > { %v610_v45 = vpop.f32.mrf.mxu1 }
  0xc7   : > { %v2160_v52 = vadd.f32 %v610_v45, %v583_v43 }
  0xca   : > { %v592_v50 = vpop.f32.mrf.mxu2 }
  0xcb   : > { %v593_v54 = vadd.f32 %v592_v50, %v2158_v46  ;;  %v620_v55 = vpop.f32.mrf.mxu3 }
  0xcc   : > { %v585_v62 = vpop.f32.mrf.mxu0 }
  0xcd   : > { %v2163_v56 = vadd.f32 %v620_v55, %v593_v54  ;;  %v586_v45 = vadd.f32 %v585_v62, %v475_v59  ;;  %v2214_v62 = vpop.permute.xlu2 %846 }
  0xce   : > { %v613_v33 = vpop.f32.mrf.mxu1 }
  0xcf   : > { %762 = vmatmul.bf16.gmra.mxu2 %v553_v36 }
  0xd0   : > { %790 = vmatmul.bf16.gmra.mxu3 %v554_v37 }
  0xd2   : > { %v595_v57 = vpop.f32.mrf.mxu2 }
  0xd3   : > { %v2165_v58 = vpop.f32.mrf.mxu3 }
  0xd4   : > { %v587_v3 = vpop.f32.mrf.mxu0 }
  0xd5   : > { %v588_v49 = vadd.f32 %v587_v3, %v480_v0 }
  0xd6   : > { %v615_v5 = vpop.f32.mrf.mxu1 }
  0xda   : > { %v597_v60 = vpop.f32.mrf.mxu2 }
  0xdb   : > { %v625_v61 = vpop.f32.mrf.mxu3  ;;  %v616_v60 = vadd.f32 %v615_v5, %v588_v49 }
  0xe2   : > { %v2167_v63 = vpop.f32.mrf.mxu2 }
  0xe3   : > { %v2169_v1 = vpop.f32.mrf.mxu3 }
  0xe7   : > { %v692_v11 = vpop.f32.mrf.mxu0 }
  0xe8   : > { %v693_v18 = vadd.f32 %v692_v11, %v465_v4  ;;  %v2196_v4 = vpop.permute.xlu0 %494  ;;  %v614_v11 = vadd.f32 %v613_v33, %v586_v45 }
  0xe9   : > { %v720_v13 = vpop.f32.mrf.mxu1  ;;  %v596_v50 = vadd.f32 %v595_v57, %v2196_v4 }
  0xea   : > { %v2171_v8 = vpop.f32.mrf.mxu2  ;;  %v2181_v20 = vadd.f32 %v720_v13, %v693_v18 }
  0xeb   : > { %v2173_v9 = vpop.f32.mrf.mxu3 }
  0xef   : > { %v694_v22 = vpop.f32.mrf.mxu0 }
  0xf0   : > { %v695_v25 = vadd.f32 %v694_v22, %v470_v51  ;;  %v2202_v51 = vpop.permute.xlu1 %808  ;;  %v2205_v54 = vpop.permute.xlu0 %862 }
  0xf1   : > { %v722_v23 = vpop.f32.mrf.mxu1 }
  0xf2   : > { %v641_v14 = vpop.f32.mrf.mxu2  ;;  %v2187_v28 = vadd.f32 %v722_v23, %v695_v25 }
  0xf3   : > { %v2179_v17 = vpop.f32.mrf.mxu3  ;;  %v642_v5 = vadd.f32 %v641_v14, %v614_v11 }
  0xf7   : > { %v697_v30 = vpop.f32.mrf.mxu0 }
  0xf8   : > { %v698_v31 = vadd.f32 %v697_v30, %v475_v59  ;;  %v624_v59 = vadd.f32 %v2165_v58, %v596_v50  ;;  %v2223_v33 = vpop.permute.xlu1 %850  ;;  %v639_v58 = vadd.f32 %v2171_v8, %v2160_v52  ;;  %v2235_v14 = vpop.permute.xlu0 %804  ;;  %v637_v52 = vadd.f32 %v2167_v63, %v2153_v48 }
  0xf9   : > { %v725_v32 = vpop.f32.mrf.mxu1  ;;  %v2244_v8 = vadd.f32 %v2179_v17, %v642_v5  ;;  %v2258_v17 = vpop.permute.xlu2 %800 }
  0xfa   : > { %v643_v24 = vpop.f32.mrf.mxu2  ;;  %v2194_v36 = vadd.f32 %v725_v32, %v698_v31 }
  0xfb   : > { %v671_v21 = vpop.f32.mrf.mxu3  ;;  %v644_v57 = vadd.f32 %v643_v24, %v616_v60 }
  0xfd   : > { %v2229_v24 = vadd.f32 %v671_v21, %v644_v57 }
  0xff   : > { %v699_v2 = vpop.f32.mrf.mxu0 }
 0x100   : > { %v700_v43 = vadd.f32 %v699_v2, %v480_v0  ;;  %v2271_v11 = vpop.permute.xlu1 %842 }
 0x101   : > { %v727_v40 = vpop.f32.mrf.mxu1 }
 0x102   : > { %v646_v37 = vpop.f32.mrf.mxu2  ;;  %v2207_v55 = vadd.f32 %v727_v40, %v700_v43  ;;  %v829_v40 = vmul.f32 %v2202_v51, %v2229_v24  ;;  %v827_v43 = vmul.f32 %v2235_v14, %v2244_v8 }
 0x103   : > { %v674_v12 = vpop.f32.mrf.mxu3  ;;  %v647_v13 = vadd.f32 %v646_v37, %v2156_v41 }
 0x104   : > { %v871_v60 = vadd.f32 %v2223_v33, %v829_v40 }
 0x105   : > { %v2219_v30 = vadd.f32 %v674_v12, %v647_v13 }
 0x107   : > { %v702_v3 = vpop.f32.mrf.mxu0  ;;  %v831_v21 = vmul.f32 %v2183_v16, %v2219_v30 }
 0x108   : > { %v703_v23 = vadd.f32 %v702_v3, %v2151_v39  ;;  %v1734_v39 = vmov 4  }
 0x109   : > { %v730_v18 = vpop.f32.mrf.mxu1  ;;  %1618 = vset.pattern.permute.xlu1 %v1734_v39  ;;  %1616 = vset.pattern.permute.xlu2 %v1734_v39  ;;  %v873_v45 = vadd.f32 %v2192_v35, %v831_v21 }
 0x10a   : > { %v648_v47 = vpop.f32.mrf.mxu2  ;;  %1039 = vperm.xlu1 %1618, %v1854_v29   ;;  %1031 = vperm.xlu2 %1616, %v1862_v34   ;;  %v2253_v29 = vadd.f32 %v2173_v9, %v639_v58 }
 0x10b   : > { %v676_v42 = vpop.f32.mrf.mxu3  ;;  %v649_v61 = vadd.f32 %v648_v47, %v2163_v56  ;;  %v2221_v56 = vadd.f32 %v730_v18, %v703_v23  ;;  %1617 = vset.pattern.permute.xlu0 %v1734_v39  ;;  %v869_v18 = vadd.f32 %v2214_v62, %v827_v43 }
 0x10c   : > { %1035 = vperm.xlu0 %1617, %v1880_v44   ;;  %v825_v50 = vmul.f32 %v2258_v17, %v2253_v29 }
 0x10d   : > { %v2216_v0 = vadd.f32 %v676_v42, %v649_v61  ;;  %v2261_v42 = vadd.f32 %v2169_v1, %v637_v52  ;;  %v883_v39 = vmax.f32 %v869_v18, 0.0 }
 0x10e   : > { %v867_v23 = vadd.f32 %v2271_v11, %v825_v50 }
 0x10f   : > { %v833_v31 = vmul.f32 %v2185_v27, %v2216_v0  ;;  %v2233_v32 = vpop.f32.mrf.mxu0  ;;  %v823_v13 = vmul.f32 %v2175_v10, %v2261_v42 }
 0x111   : > { %v2248_v12 = vpop.f32.mrf.mxu1  ;;  %v875_v48 = vadd.f32 %v2200_v7, %v833_v31 }
 0x112   : > { %v651_v22 = vpop.f32.mrf.mxu2  ;;  %1047 = vperm.xlu1 %1618, %v1892_v53   ;;  %1043 = vperm.xlu2 %1616, %v1870_v38  }
 0x113   : > { %v652_v25 = vadd.f32 %v651_v22, %v624_v59  ;;  %v679_v26 = vpop.f32.mrf.mxu3  ;;  %v889_v61 = vmax.f32 %v875_v48, 0.0  ;;  %v887_v59 = vmax.f32 %v873_v45, 0.0  ;;  %v2281_v22 = vpop.permute.xlu0 %838  ;;  %v2305_v45 = vld [vmem:[%s2676_s2] sm:$0xff] }
 0x114   : > { %1055 = vperm.xlu0 %1617, %v1919_v6   ;;  %v865_v31 = vadd.f32 %v2281_v22, %v823_v13 }
 0x115   : > { %v2225_v41 = vadd.f32 %v679_v26, %v652_v25  ;;  %v885_v25 = vmax.f32 %v871_v60, 0.0  ;;  %v904_v5 = vpack.c.bf16 %v889_v61, %v887_v59 }
 0x116   : > { %v879_v40 = vmax.f32 %v865_v31, 0.0 }
 0x117   : > { %v835_v37 = vmul.f32 %v2177_v15, %v2225_v41  ;;  %v2269_v3 = vpop.f32.mrf.mxu0  ;;  %v902_v52 = vpack.c.bf16 %v885_v25, %v883_v39  ;;  %v705_v39 = vadd.f32 %v2233_v32, %v2158_v46 }
 0x118   : > { %v708_v46 = vadd.f32 %v2269_v3, %v2196_v4 }
 0x119   : > { %v877_v2 = vadd.f32 %v2205_v54, %v835_v37  ;;  %v2279_v57 = vpop.f32.mrf.mxu1  ;;  %v881_v37 = vmax.f32 %v867_v23, 0.0 }
 0x11a   : > { %v653_v63 = vpop.f32.mrf.mxu2  ;;  %1051 = vperm.xlu2 %1616, %v1948_v19  }
 0x11b   : > { %v891_v49 = vmax.f32 %v877_v2, 0.0  ;;  %v681_v47 = vpop.f32.mrf.mxu3  ;;  %v1735_v2 = vmov 5  }
 0x11c   : > { %1619 = vset.pattern.permute.xlu1 %v1735_v2  ;;  %1621 = vset.pattern.permute.xlu0 %v1735_v2  ;;  %v2297_v47 = vld [vmem:[%s2677_s3 + $0x10] sm:$0xff] }
 0x11d   : > { %v906_v9 = vpack.c.bf16 %v891_v49, %v891_v49  ;;  %1073 = vperm.xlu1 %1619, %v1862_v34   ;;  %v900_v49 = vpack.c.bf16 %v881_v37, %v879_v40  ;;  %1081 = vperm.xlu0 %1621, %v2297_v47   ;;  %v736_v40 = vadd.f32 %v2279_v57, %v708_v46 }
 0x11f   : > { %v969_v1 = vsel %vm967_vm0, %v906_v9, 0  ;;  %v709_v21 = vpop.f32.mrf.mxu0 }
 0x120   : > { %978 = vmatpush.bf16.msra.mxu0 %v969_v1  ;;  %v2358_v21 = vld [vmem:[%s2676_s2 + $0x10] sm:$0xff] }
 0x121   : > { %v737_v48 = vpop.f32.mrf.mxu1 }
 0x122   : > { %v2285_v26 = vpop.f32.mrf.mxu2  ;;  %1620 = vset.pattern.permute.xlu2 %v1735_v2  ;;  %v1643_v48 = vld [vmem:[%s2677_s3 + $0x20] sm:$0xff] }
 0x123   : > { %v2287_v58 = vpop.f32.mrf.mxu3  ;;  %1077 = vperm.xlu2 %1620, %v1880_v44   ;;  %v2323_v44 = vld [vmem:[%s2676_s2 + $0x8] sm:$0xff] }
 0x124   : > { %979 = vmatpush.bf16.msra.mxu0 %v904_v5 }
 0x125   : > { %1085 = vperm.xlu1 %1619, %v1870_v38  }
 0x128   : > { %980 = vmatpush.bf16.msra.mxu0 %v902_v52 }
 0x12a   : > { %v2292_v63 = vpop.f32.mrf.mxu2 }
 0x12b   : > { %v2300_v43 = vpop.f32.mrf.mxu3  ;;  %1089 = vperm.xlu2 %1620, %v1892_v53   ;;  %v751_v57 = vadd.f32 %v2292_v63, %v2187_v28 }
 0x12c   : > { %981 = vmatpush.bf16.msra.mxu0 %v900_v49 }
 0x12d   : > { %1093 = vperm.xlu1 %1619, %v1948_v19  }
 0x12f   : > { %1489 = vmatmul.msk.bf16.vlgmr.msra.gmra.mxu0 %vm954_vm1, %v2305_v45 }
 0x132   : > { %v753_v34 = vpop.f32.mrf.mxu2 }
 0x133   : > { %v754_v9 = vadd.f32 %v753_v34, %v2194_v36  ;;  %v781_v50 = vpop.f32.mrf.mxu3  ;;  %v1736_v36 = vmov 6  }
 0x134   : > { %1623 = vset.pattern.permute.xlu0 %v1736_v36  ;;  %1622 = vset.pattern.permute.xlu2 %v1736_v36 }
 0x135   : > { %v2312_v60 = vadd.f32 %v781_v50, %v754_v9  ;;  %1624 = vset.pattern.permute.xlu1 %v1736_v36 }
 0x136   : > { %1137 = vperm.xlu1 %1624, %v2297_v47  }
 0x137   : > { %2686 = vst [vmem:[#allocation5_spill] sm:$0xff] %v2312_v60  ;;  %v828_v61 = vmul.f32 %v2235_v14, %v2312_v60  ;;  %v2330_v14 = vld [vmem:[%s2677_s3 + $0x8] sm:$0xff] }
 0x138   : > { %1133 = vperm.xlu0 %1623, %v2330_v14  }
 0x139   : > { %v870_v1 = vadd.f32 %v2214_v62, %v828_v61  ;;  %v2342_v62 = vld [vmem:[%s2677_s3] sm:$0xff] }
 0x13a   : > { %v755_v13 = vpop.f32.mrf.mxu2  ;;  %1129 = vperm.xlu2 %1622, %v2342_v62  }
 0x13b   : > { %v756_v38 = vadd.f32 %v755_v13, %v2207_v55  ;;  %v783_v18 = vpop.f32.mrf.mxu3  ;;  %v884_v25 = vmax.f32 %v870_v1, 0.0 }
 0x13d   : > { %v2325_v59 = vadd.f32 %v783_v18, %v756_v38  ;;  %v2392_v18 = vadd.f32 %v2300_v43, %v751_v57 }
 0x13e   : > { %1625 = vset.pattern.permute.xlu1 %v1735_v2 }
 0x13f   : > { %2687 = vst [vmem:[#allocation6_spill] sm:$0xff] %v2325_v59  ;;  %v830_v53 = vmul.f32 %v2202_v51, %v2325_v59  ;;  %1490 = vmatmul.msk.bf16.gmra.mxu0 %vm954_vm1, %v2323_v44  ;;  %1097 = vperm.xlu1 %1625, %v1919_v6  }
 0x140   : > { %1149 = vperm.xlu0 %1623, %v1948_v19   ;;  %v733_v19 = vadd.f32 %v2248_v12, %v705_v39  ;;  %v1738_v39 = vmov 8  }
 0x141   : > { %v872_v55 = vadd.f32 %v2223_v33, %v830_v53  ;;  %v2351_v33 = vld [vmem:[%s2677_s3 + $0x18] sm:$0xff] }
 0x142   : > { %v758_v23 = vpop.f32.mrf.mxu2  ;;  %1141 = vperm.xlu2 %1622, %v2351_v33  }
 0x143   : > { %v886_v5 = vmax.f32 %v872_v55, 0.0  ;;  %v786_v51 = vpop.f32.mrf.mxu3  ;;  %v759_v2 = vadd.f32 %v758_v23, %v2221_v56  ;;  %v899_v56 = vld [vmem:[%s2676_s2 + $0x18] sm:$0xf] }
 0x144   : > { %v949_v1 = vunpack.c.l.b16 %v899_v56 }
 0x145   : > { %v903_v31 = vpack.c.bf16 %v886_v5, %v884_v25  ;;  %v2373_v4 = vadd.f32 %v786_v51, %v759_v2  ;;  %v1737_v51 = vmov 7  }
 0x146   : > { %v953_v53 = vpack.c.b16 %v949_v1, %v949_v1 }
 0x147   : > { %1626 = vset.pattern.permute.xlu1 %v1736_v36  ;;  %2689 = vst [vmem:[#allocation8_spill] sm:$0xff] %v2373_v4  ;;  %v832_v13 = vmul.f32 %v2183_v16, %v2373_v4  ;;  %v826_v16 = vmul.f32 %v2258_v17, %v2392_v18 }
 0x148   : > { %1153 = vperm.xlu1 %1626, %v1919_v6   ;;  %v749_v6 = vadd.f32 %v2285_v26, %v2181_v20  ;;  %1628 = vset.pattern.permute.xlu0 %v1737_v51 }
 0x149   : > { %v874_v55 = vadd.f32 %v2192_v35, %v832_v13  ;;  %v868_v23 = vadd.f32 %v2271_v11, %v826_v16  ;;  %1255 = vperm.xlu0 %1628, %v2342_v62   ;;  %v1644_v11 = vld [vmem:[%s2677_s3 + $0x28] sm:$0xff] }
 0x14a   : > { %v760_v37 = vpop.f32.mrf.mxu2  ;;  %1145 = vperm.xlu2 %1622, %v1643_v48  }
 0x14b   : > { %v788_v52 = vpop.f32.mrf.mxu3  ;;  %v761_v32 = vadd.f32 %v760_v37, %v733_v19  ;;  %v888_v43 = vmax.f32 %v874_v55, 0.0  ;;  %v882_v35 = vmax.f32 %v868_v23, 0.0  ;;  %v2445_v19 = vpop.permute.xlu0 %921 }
 0x14d   : > { %v2370_v49 = vadd.f32 %v788_v52, %v761_v32 }
 0x14f   : > { %1491 = vmatmul.msk.bf16.gmra.mxu0 %vm954_vm1, %v2358_v21  ;;  %2688 = vst [vmem:[#allocation7_spill] sm:$0xff] %v2370_v49  ;;  %v834_v50 = vmul.f32 %v2185_v27, %v2370_v49 }
 0x150   : > { %1629 = vset.pattern.permute.xlu1 %v1737_v51 }
 0x151   : > { %v876_v28 = vadd.f32 %v2200_v7, %v834_v50  ;;  %1259 = vperm.xlu1 %1629, %v2330_v14   ;;  %1275 = vperm.xlu0 %1628, %v1644_v11  }
 0x152   : > { %v763_v34 = vpop.f32.mrf.mxu2  ;;  %1627 = vset.pattern.permute.xlu2 %v1738_v39 }
 0x153   : > { %v764_v12 = vadd.f32 %v763_v34, %v736_v40  ;;  %v791_v9 = vpop.f32.mrf.mxu3  ;;  %v890_v26 = vmax.f32 %v876_v28, 0.0  ;;  %1195 = vperm.xlu2 %1627, %v2342_v62  }
 0x155   : > { %v2378_v3 = vadd.f32 %v791_v9, %v764_v12 }
 0x157   : > { %2690 = vst [vmem:[#allocation9_spill] sm:$0xff] %v2378_v3  ;;  %v836_v61 = vmul.f32 %v2177_v15, %v2378_v3  ;;  %v2396_v15 = vadd.f32 %v2287_v58, %v749_v6  ;;  %v905_v58 = vpack.c.bf16 %v890_v26, %v888_v43 }
 0x159   : > { %v878_v38 = vadd.f32 %v2205_v54, %v836_v61  ;;  %v824_v7 = vmul.f32 %v2175_v10, %v2396_v15  ;;  %v2412_v10 = vpop.permute.xlu2 %909  ;;  %1267 = vperm.xlu1 %1629, %v2351_v33  }
 0x15a   : > { %v765_v63 = vpop.f32.mrf.mxu2 }
 0x15b   : > { %v892_v36 = vmax.f32 %v878_v38, 0.0  ;;  %v793_v27 = vpop.f32.mrf.mxu3  ;;  %v866_v25 = vadd.f32 %v2281_v22, %v824_v7  ;;  %1630 = vset.pattern.permute.xlu2 %v1737_v51  ;;  %v2419_v22 = vpop.permute.xlu1 %913 }
 0x15c   : > { %1263 = vperm.xlu2 %1630, %v2297_v47  }
 0x15d   : > { %v907_v20 = vpack.c.bf16 %v892_v36, %v892_v36  ;;  %v880_v5 = vmax.f32 %v866_v25, 0.0 }
 0x15f   : > { %1492 = vmatmul.msk.bf16.gmra.mxu0 %vm954_vm1, %v953_v53  ;;  %v972_v54 = vsel %vm967_vm0, %v907_v20, 0  ;;  %v901_v17 = vpack.c.bf16 %v882_v35, %v880_v5 }
 0x160   : > { %1006 = vmatpush.bf16.msra.mxu1 %v972_v54 }
 0x161   : > { %v2426_v14 = vpop.permute.xlu2 %917 }
 0x163   : > { %v2428_v62 = vpop.permute.xlu1 %925 }
 0x164   : > { %1007 = vmatpush.bf16.msra.mxu1 %v905_v58  ;;  %1271 = vperm.xlu2 %1630, %v1643_v48  }
 0x168   : > { %1008 = vmatpush.bf16.msra.mxu1 %v903_v31 }
 0x169   : > { %v2430_v31 = vpop.permute.xlu2 %929 }
 0x16b   : > { %v2434_v47 = vpop.permute.xlu1 %933 }
 0x16c   : > { %1009 = vmatpush.bf16.msra.mxu1 %v901_v17 }
 0x16f   : > { %1493 = vmatmul.msk.bf16.vlgmr.msra.gmra.mxu1 %vm954_vm1, %v2305_v45  ;;  %v1645_v45 = vld [vmem:[%s2677_s3 + $0x30] sm:$0xff] }
 0x170   : > { %1279 = vperm.xlu1 %1629, %v1645_v45  }
 0x171   : > { %v2436_v33 = vpop.permute.xlu2 %1031 }
 0x179   : > { %v2441_v37 = vpop.permute.xlu2 %1043 }
 0x17f   : > { %1494 = vmatmul.msk.bf16.gmra.mxu1 %vm954_vm1, %v2323_v44  ;;  %v2438_v44 = vpop.permute.xlu1 %1039 }
 0x181   : > { %v2447_v46 = vpop.permute.xlu2 %1051 }
 0x187   : > { %v2443_v52 = vpop.permute.xlu1 %1047 }
 0x189   : > { %v2453_v48 = vpop.permute.xlu2 %1077 }
 0x18f   : > { %1495 = vmatmul.msk.bf16.gmra.mxu1 %vm954_vm1, %v2358_v21  ;;  %v2449_v2 = vpop.permute.xlu1 %1073  ;;  %v2451_v21 = vpop.permute.xlu0 %1035 }
 0x191   : > { %v2459_v56 = vpop.permute.xlu2 %1089 }
 0x197   : > { %v2455_v34 = vpop.permute.xlu1 %1085  ;;  %v2457_v12 = vpop.permute.xlu0 %1055 }
 0x199   : > { %v2475_v28 = vpop.permute.xlu2 %1129 }
 0x19f   : > { %1496 = vmatmul.msk.bf16.gmra.mxu1 %vm954_vm1, %v953_v53  ;;  %v2467_v1 = vpop.permute.xlu1 %1093  ;;  %v2469_v6 = vpop.permute.xlu0 %1081 }
 0x1a1   : > { %v2498_v35 = vpop.permute.xlu2 %1141 }
 0x1a8   : > { %v2487_v26 = vpop.permute.xlu1 %1137 }
 0x1aa   : > { %v2492_v23 = vpop.permute.xlu0 %1133 }
 0x1ac   : > { %v983_v32 = vpop.f32.mrf.mxu0 }
 0x1ad   : > { %v2462_v57 = vadd.f32 %v983_v32, %v2412_v10 }
 0x1af   : > { %v1058_v13 = vmul.f32 %v2436_v33, %v2462_v57 }
 0x1b1   : > { %v1100_v36 = vadd.f32 %v2449_v2, %v1058_v13 }
 0x1b3   : > { %v1114_v16 = vmax.f32 %v1100_v36, 0.0 }
 0x1b4   : > { %v985_v40 = vpop.f32.mrf.mxu0 }
 0x1b5   : > { %v2465_v50 = vadd.f32 %v985_v40, %v2419_v22  ;;  %v1156_v25 = vmul.f32 %v2475_v28, %v1114_v16 }
 0x1b7   : > { %v1060_v38 = vmul.f32 %v2451_v21, %v2465_v50 }
 0x1b9   : > { %v1102_v27 = vadd.f32 %v2453_v48, %v1060_v38  ;;  %v2511_v38 = vpop.permute.xlu1 %1097 }
 0x1bb   : > { %v1116_v54 = vmax.f32 %v1102_v27, 0.0 }
 0x1bc   : > { %v988_v9 = vpop.f32.mrf.mxu0 }
 0x1bd   : > { %v2478_v63 = vadd.f32 %v988_v9, %v2426_v14  ;;  %v1158_v5 = vmul.f32 %v2492_v23, %v1116_v54  ;;  %v2515_v54 = vpop.permute.xlu2 %1145 }
 0x1bf   : > { %v1062_v53 = vmul.f32 %v2438_v44, %v2478_v63  ;;  %v1170_v32 = vadd.f32 %v1158_v5, %v1156_v25  ;;  %v2520_v25 = vpop.permute.xlu0 %1149 }
 0x1c1   : > { %v1104_v43 = vadd.f32 %v2469_v6, %v1062_v53 }
 0x1c3   : > { %v1118_v51 = vmax.f32 %v1104_v43, 0.0 }
 0x1c4   : > { %v990_v61 = vpop.f32.mrf.mxu0 }
 0x1c5   : > { %v2485_v20 = vadd.f32 %v990_v61, %v2445_v19  ;;  %v1160_v40 = vmul.f32 %v2487_v26, %v1118_v51 }
 0x1c7   : > { %v1064_v7 = vmul.f32 %v2441_v37, %v2485_v20  ;;  %v1171_v53 = vadd.f32 %v1170_v32, %v1160_v40  ;;  %v2527_v32 = vpop.permute.xlu1 %1153 }
 0x1c9   : > { %v1106_v39 = vadd.f32 %v2455_v34, %v1064_v7 }
 0x1cb   : > { %v1120_v61 = vmax.f32 %v1106_v39, 0.0 }
 0x1cc   : > { %v993_v55 = vpop.f32.mrf.mxu0 }
 0x1cd   : > { %v2495_v58 = vadd.f32 %v993_v55, %v2428_v62  ;;  %v1162_v27 = vmul.f32 %v2498_v35, %v1120_v61 }
 0x1cf   : > { %v1066_v17 = vmul.f32 %v2443_v52, %v2495_v58  ;;  %v1172_v51 = vadd.f32 %v1171_v53, %v1162_v27  ;;  %v2530_v27 = vpop.permute.xlu2 %1195 }
 0x1d1   : > { %v1108_v13 = vadd.f32 %v2459_v56, %v1066_v17 }
 0x1d3   : > { %v1122_v55 = vmax.f32 %v1108_v13, 0.0 }
 0x1d4   : > { %v995_v11 = vpop.f32.mrf.mxu0 }
 0x1d5   : > { %v2505_v45 = vadd.f32 %v995_v11, %v2430_v31  ;;  %v1164_v17 = vmul.f32 %v2515_v54, %v1122_v55 }
 0x1d7   : > { %v1068_v9 = vmul.f32 %v2447_v46, %v2505_v45  ;;  %v1173_v40 = vadd.f32 %v1172_v51, %v1164_v17 }
 0x1d9   : > { %v1110_v36 = vadd.f32 %v2467_v1, %v1068_v9 }
 0x1db   : > { %v1124_v43 = vmax.f32 %v1110_v36, 0.0 }
 0x1dc   : > { %v998_v16 = vpop.f32.mrf.mxu0 }
 0x1dd   : > { %v2518_v7 = vadd.f32 %v998_v16, %v2434_v47  ;;  %v1166_v39 = vmul.f32 %v2520_v25, %v1124_v43 }
 0x1df   : > { %v1070_v5 = vmul.f32 %v2457_v12, %v2518_v7  ;;  %v1174_v13 = vadd.f32 %v1173_v40, %v1166_v39 }
 0x1e1   : > { %v1112_v11 = vadd.f32 %v2511_v38, %v1070_v5 }
 0x1e3   : > { %v1126_v9 = vmax.f32 %v1112_v11, 0.0 }
 0x1e4   : > { %v1000_v61 = vpop.f32.mrf.mxu0 }
 0x1e5   : > { %v1168_v36 = vmul.f32 %v2527_v32, %v1126_v9 }
 0x1e7   : > { %v1175_v16 = vadd.f32 %v1174_v13, %v1168_v36 }
 0x1e9   : > { %v1176_v3 = vrot.slane %v1175_v16, 4 }
 0x1eb   : > { %v1177_v49 = vadd.f32 %v1176_v3, %v1175_v16 }
 0x1ec   : > { %v1011_v4 = vpop.f32.mrf.mxu1 }
 0x1ed   : > { %v1178_v59 = vrot.slane %v1177_v49, 2  ;;  %v2533_v53 = vadd.f32 %v1011_v4, %v2412_v10 }
 0x1ef   : > { %v1179_v60 = vadd.f32 %v1178_v59, %v1177_v49  ;;  %v1059_v39 = vmul.f32 %v2436_v33, %v2533_v53  ;;  %v2550_v33 = vpop.permute.xlu1 %1259 }
 0x1f1   : > { %v1180_v55 = vrot.slane %v1179_v60, 1  ;;  %v1101_v4 = vadd.f32 %v2449_v2, %v1059_v39  ;;  %v2567_v39 = vpop.permute.xlu0 %1255 }
 0x1f3   : > { %v1181_v43 = vadd.f32 %v1180_v55, %v1179_v60 }
 0x1f4   : > { %v1013_v5 = vpop.f32.mrf.mxu1 }
 0x1f5   : > { %v1198_v17 = vadd.f32 %v2530_v27, %v1181_v43  ;;  %v2537_v51 = vadd.f32 %v1013_v5, %v2419_v22  ;;  %v1115_v22 = vmax.f32 %v1101_v4, 0.0 }
 0x1f7   : > { %v1497_v3 = vmul.f32 -1.442695, %v1198_v17  ;;  %v1061_v59 = vmul.f32 %v2451_v21, %v2537_v51  ;;  %v1157_v2 = vmul.f32 %v2475_v28, %v1115_v22  ;;  %v2562_v17 = vpop.permute.xlu2 %1263  ;;  %v2564_v28 = vpop.permute.xlu1 %1267 }
 0x1f9   : > { %1631 = vpow2.f32 %v1497_v3  ;;  %v1103_v49 = vadd.f32 %v2453_v48, %v1061_v59 }
 0x1fb   : > { %v1117_v60 = vmax.f32 %v1103_v49, 0.0 }
 0x1fc   : > { %v1016_v10 = vpop.f32.mrf.mxu1 }
 0x1fd   : > { %v2546_v11 = vadd.f32 %v1016_v10, %v2426_v14  ;;  %v1159_v21 = vmul.f32 %v2492_v23, %v1117_v60 }
 0x1ff   : > { %v1632_v40 = vpop.eup %1631  ;;  %v1063_v9 = vmul.f32 %v2438_v44, %v2546_v11  ;;  %v1182_v14 = vadd.f32 %v1159_v21, %v1157_v2 }
 0x200   : > { %v1206_v61 = vadd.f32 1.0, %v1632_v40 }
 0x201   : > { %v1105_v48 = vadd.f32 %v2469_v6, %v1063_v9 }
 0x202   : > { %1633 = vrcp.f32 %v1206_v61  ;;  %v1219_v59 = vand.u32 2147483648, %v1206_v61  ;;  %vm1213_vm3 = vweird.f32 %v1206_v61 }
 0x203   : > { %v1119_v13 = vmax.f32 %v1105_v48, 0.0 }
 0x204   : > { %v1018_v36 = vpop.f32.mrf.mxu1  ;;  %v1220_v22 = vor.u32 1.1754944e-38, %v1219_v59 }
 0x205   : > { %v1161_v16 = vmul.f32 %v2487_v26, %v1119_v13  ;;  %v2557_v55 = vadd.f32 %v1018_v36, %v2445_v19  ;;  %v1217_v19 = vand.u32 2147483647, %v1206_v61  ;;  %v2577_v13 = vpop.permute.xlu2 %1271  ;;  %v1242_v36 = vadd.f32 %v2478_v63, %v2244_v8 }
 0x207   : > { %v1183_v44 = vadd.f32 %v1182_v14, %v1161_v16  ;;  %v1065_v43 = vmul.f32 %v2441_v37, %v2557_v55  ;;  %vm1218_vm5 = vcmp.eq.f32.partialorder %v1217_v19, 8.507059e+37  ;;  %v2589_v14 = vpop.permute.xlu0 %1275 }
 0x208   : > { %v1634_v5 = vpop.eup %1633 }
 0x209   : > { %v1209_v23 = vmul.f32 %v1634_v5, %v1206_v61  ;;  %v1107_v6 = vadd.f32 %v2455_v34, %v1065_v43  ;;  %vm1214_vm2 = vweird.f32 %v1634_v5  ;;  %v1238_v61 = vadd.f32 %v2462_v57, %v2261_v42 }
 0x20a   : > { %vm1215_vm4 = vmor %vm1213_vm3, %vm1214_vm2 }
 0x20b   : > { %v1210_v26 = vsub.f32 1.0, %v1209_v23  ;;  %v1121_v3 = vmax.f32 %v1107_v6, 0.0 }
 0x20c   : > { %v1021_v49 = vpop.f32.mrf.mxu1 }
 0x20d   : > { %v1211_v4 = vmul.f32 %v1634_v5, %v1210_v26  ;;  %v1163_v37 = vmul.f32 %v2498_v35, %v1121_v3  ;;  %v2571_v10 = vadd.f32 %v1021_v49, %v2428_v62  ;;  %v2579_v62 = vpop.permute.xlu1 %1279 }
 0x20f   : > { %v1212_v34 = vadd.f32 %v1634_v5, %v1211_v4  ;;  %v1184_v60 = vadd.f32 %v1183_v44, %v1163_v37  ;;  %v1067_v40 = vmul.f32 %v2443_v52, %v2571_v10  ;;  %v1240_v52 = vadd.f32 %v2465_v50, %v2253_v29 }
 0x210   : > { %v1246_v29 = vadd.f32 %v2495_v58, %v2219_v30  ;;  %v1250_v58 = vadd.f32 %v2518_v7, %v2225_v41 }
 0x211   : > { %v1216_v9 = vsel %vm1215_vm4, %v1634_v5, %v1212_v34  ;;  %v1109_v21 = vadd.f32 %v2459_v56, %v1067_v40  ;;  %v1244_v56 = vadd.f32 %v2485_v20, %v2229_v24 }
 0x212   : > { %v1221_v48 = vsel %vm1218_vm5, %v1220_v22, %v1216_v9 }
 0x213   : > { %v1252_v2 = vperm.slane %v1221_v48, 0  ;;  %v1123_v35 = vmax.f32 %v1109_v21, 0.0 }
 0x214   : > { %v1023_v16 = vpop.f32.mrf.mxu1 }
 0x215   : > { %v1284_v44 = vmul.f32 %v2550_v33, %v1252_v2  ;;  %v1286_v43 = vmul.f32 %v2562_v17, %v1252_v2  ;;  %v1288_v5 = vmul.f32 %v2564_v28, %v1252_v2  ;;  %v1282_v42 = vmul.f32 %v2567_v39, %v1252_v2 }
 0x216   : > { %v1165_v24 = vmul.f32 %v2515_v54, %v1123_v35  ;;  %v1290_v8 = vmul.f32 %v2577_v13, %v1252_v2  ;;  %v1294_v57 = vmul.f32 %v2579_v62, %v1252_v2  ;;  %v1292_v30 = vmul.f32 %v2589_v14, %v1252_v2 }
 0x217   : > { %v1298_v50 = vadd.f32 %v1284_v44, %v1240_v52  ;;  %v1300_v63 = vadd.f32 %v1286_v43, %v1242_v36  ;;  %v1302_v20 = vadd.f32 %v1288_v5, %v1244_v56  ;;  %v1296_v23 = vadd.f32 %v1282_v42, %v1238_v61 }
 0x218   : > { %v1185_v6 = vadd.f32 %v1184_v60, %v1165_v24  ;;  %v1248_v54 = vadd.f32 %v2505_v45, %v2216_v0  ;;  %v1304_v26 = vadd.f32 %v1290_v8, %v1246_v29  ;;  %v2612_v3 = vadd.f32 %v1023_v16, %v2430_v31  ;;  %v2691_v8 = vld [vmem:[#allocation5_spill] sm:$0xff] }
 0x219   : > { %1312 = vst [vmem:[%s2600_s15 + $0x10] sm:$0xff] %v1298_v50  ;;  %v1308_v19 = vadd.f32 %v1294_v57, %v1250_v58  ;;  %v1239_v29 = vadd.f32 %v2533_v53, %v2396_v15  ;;  %v1241_v24 = vadd.f32 %v2537_v51, %v2392_v18  ;;  %v1243_v57 = vadd.f32 %v2546_v11, %v2691_v8  ;;  %v2692_v50 = vld [vmem:[#allocation6_spill] sm:$0xff]  ;;  %v2693_v15 = vld [vmem:[#allocation8_spill] sm:$0xff] }
 0x21a   : > { %1314 = vst [vmem:[%s2600_s15 + $0x20] sm:$0xff] %v1300_v63  ;;  %v1306_v59 = vadd.f32 %v1292_v30, %v1248_v54  ;;  %v1069_v49 = vmul.f32 %v2447_v46, %v2612_v3  ;;  %v1245_v63 = vadd.f32 %v2557_v55, %v2692_v50  ;;  %v1247_v18 = vadd.f32 %v2571_v10, %v2693_v15  ;;  %v2695_v54 = vld [vmem:[#allocation9_spill] sm:$0xff] }
 0x21b   : > { %1316 = vst [vmem:[%s2600_s15 + $0x30] sm:$0xff] %v1302_v20 }
 0x21c   : > { %1310 = vst [vmem:[%s2600_s15] sm:$0xff] %v1296_v23  ;;  %v1026_v41 = vpop.f32.mrf.mxu1  ;;  %v1111_v7 = vadd.f32 %v2467_v1, %v1069_v49 }
 0x21d   : > { %1318 = vst [vmem:[%s2600_s15 + $0x40] sm:$0xff] %v1304_v26  ;;  %v1027_v4 = vadd.f32 %v1026_v41, %v2434_v47 }
 0x21e   : > { %1322 = vst [vmem:[%s2600_s15 + $0x60] sm:$0xff] %v1308_v19  ;;  %v1125_v0 = vmax.f32 %v1111_v7, 0.0 }
 0x21f   : > { %1320 = vst [vmem:[%s2600_s15 + $0x50] sm:$0xff] %v1306_v59  ;;  %v1071_v31 = vmul.f32 %v2457_v12, %v1027_v4  ;;  %v1251_v26 = vadd.f32 %v1027_v4, %v2695_v54 }
 0x220   : > { %v1167_v45 = vmul.f32 %v2520_v25, %v1125_v0 }
 0x221   : > { %v1113_v37 = vadd.f32 %v2511_v38, %v1071_v31 }
 0x222   : > { %v1186_v34 = vadd.f32 %v1185_v6, %v1167_v45  ;;  %v2694_v6 = vld [vmem:[#allocation7_spill] sm:$0xff] }
 0x223   : > { %v1127_v60 = vmax.f32 %v1113_v37, 0.0 }
 0x224   : > { %v1028_v40 = vpop.f32.mrf.mxu1 }
 0x225   : > { %v1169_v46 = vmul.f32 %v2527_v32, %v1127_v60 }
 0x227   : > { %v1187_v22 = vadd.f32 %v1186_v34, %v1169_v46 }
 0x229   : > { %v1188_v9 = vrot.slane %v1187_v22, 4 }
 0x22b   : > { %v1189_v21 = vadd.f32 %v1188_v9, %v1187_v22 }
 0x22d   : > { %v1190_v1 = vrot.slane %v1189_v21, 2 }
 0x22f   : > { %v1191_v48 = vadd.f32 %v1190_v1, %v1189_v21 }
 0x231   : > { %v1192_v47 = vrot.slane %v1191_v48, 1 }
 0x233   : > { %v1193_v2 = vadd.f32 %v1192_v47, %v1191_v48 }
 0x235   : > { %v1199_v35 = vadd.f32 %v2530_v27, %v1193_v2 }
 0x237   : > { %v1498_v61 = vmul.f32 -1.442695, %v1199_v35 }
 0x239   : > { %1635 = vpow2.f32 %v1498_v61 }
 0x23f   : > { %v1636_v12 = vpop.eup %1635 }
 0x240   : > { %v1207_v25 = vadd.f32 1.0, %v1636_v12 }
 0x242   : > { %1637 = vrcp.f32 %v1207_v25  ;;  %v1234_v56 = vand.u32 2147483648, %v1207_v25  ;;  %v1232_v32 = vand.u32 2147483647, %v1207_v25  ;;  %vm1228_vm7 = vweird.f32 %v1207_v25 }
 0x244   : > { %v1235_v43 = vor.u32 1.1754944e-38, %v1234_v56  ;;  %vm1233_vm9 = vcmp.eq.f32.partialorder %v1232_v32, 8.507059e+37 }
 0x248   : > { %v1638_v38 = vpop.eup %1637 }
 0x249   : > { %v1224_v52 = vmul.f32 %v1638_v38, %v1207_v25  ;;  %vm1229_vm6 = vweird.f32 %v1638_v38 }
 0x24a   : > { %vm1230_vm8 = vmor %vm1228_vm7, %vm1229_vm6 }
 0x24b   : > { %v1225_v36 = vsub.f32 1.0, %v1224_v52 }
 0x24d   : > { %v1226_v16 = vmul.f32 %v1638_v38, %v1225_v36 }
 0x24f   : > { %v1227_v44 = vadd.f32 %v1638_v38, %v1226_v16 }
 0x251   : > { %v1231_v5 = vsel %vm1230_vm8, %v1638_v38, %v1227_v44 }
 0x252   : > { %v1236_v42 = vsel %vm1233_vm9, %v1235_v43, %v1231_v5 }
 0x253   : > { %v1253_v27 = vperm.slane %v1236_v42, 0 }
 0x255   : > { %v1283_v20 = vmul.f32 %v2567_v39, %v1253_v27  ;;  %v1285_v30 = vmul.f32 %v2550_v33, %v1253_v27  ;;  %v1287_v58 = vmul.f32 %v2562_v17, %v1253_v27  ;;  %v1289_v23 = vmul.f32 %v2564_v28, %v1253_v27 }
 0x256   : > { %v1291_v53 = vmul.f32 %v2577_v13, %v1253_v27  ;;  %v1293_v51 = vmul.f32 %v2589_v14, %v1253_v27  ;;  %v1295_v11 = vmul.f32 %v2579_v62, %v1253_v27  ;;  %v1249_v28 = vadd.f32 %v2612_v3, %v2694_v6 }
 0x257   : > { %v1297_v33 = vadd.f32 %v1283_v20, %v1239_v29  ;;  %v1299_v55 = vadd.f32 %v1285_v30, %v1241_v24  ;;  %v1301_v39 = vadd.f32 %v1287_v58, %v1243_v57  ;;  %v1303_v17 = vadd.f32 %v1289_v23, %v1245_v63 }
 0x258   : > { %v1305_v10 = vadd.f32 %v1291_v53, %v1247_v18  ;;  %v1307_v19 = vadd.f32 %v1293_v51, %v1249_v28  ;;  %v1309_v13 = vadd.f32 %v1295_v11, %v1251_v26 }
 0x259   : > { %1311 = vst [vmem:[%s2600_s15 + $0x8] sm:$0xff] %v1297_v33 }
 0x25a   : > { %1313 = vst [vmem:[%s2600_s15 + $0x18] sm:$0xff] %v1299_v55 }
 0x25b   : > { %1315 = vst [vmem:[%s2600_s15 + $0x28] sm:$0xff] %v1301_v39 }
 0x25c   : > { %1317 = vst [vmem:[%s2600_s15 + $0x38] sm:$0xff] %v1303_v17 }
 0x25d   : > { %1319 = vst [vmem:[%s2600_s15 + $0x48] sm:$0xff] %v1305_v10 }
 0x25e   : > { %1321 = vst [vmem:[%s2600_s15 + $0x58] sm:$0xff] %v1307_v19 }
 0x25f   : > { %1323 = vst [vmem:[%s2600_s15 + $0x68] sm:$0xff] %v1309_v13 }
 0x260 PF: > { %s17_s20 = sadd.s32 1, %s1726_s20   ;;  %s2696_s15 = smov %s1710_s16 }
 0x261   : > { %p14_p0 = scmp.ge.s32.totalorder %s17_s20, 4   ;;  %s2697_s16 = smov %s1714_s17 }
 0x262   : > { %s2698_s17 = smov %s1813_s27  ;;  %s2699_s18 = smov %s1722_s19 }
 0x263   : > { %s2700_s19 = smov %s2702_s22  ;;  %16 = sbr.rel (!%p14_p0) target bundleno = 4 (0x4), region = 76 }
 0x268   :  { %1354 = vsyncpa [#allocation3], 1 }
 0x269   :  { %1356 = vsyncpa [#allocation3 + $0x1], 1 }

</bundles_post_ra>
